<compile_context>
chip_gen: v5e
topology: v5e:2x2
jax: 0.10.0
libtpu: 0.0.40
codegen_flags: <defaults>
</compile_context>

<pallas_src>
import functools

import jax
import jax.numpy as jnp
import numpy as np
from jax.experimental import pallas as pl
from jax.experimental.pallas import tpu as pltpu


_VMEM_BUFFER_BUDGET = 24 * 1024 * 1024   # bytes allotted to pipeline buffers
_VMEM_LIMIT_BYTES = 40 * 1024 * 1024     # scoped-VMEM limit (headroom on v7x 64 MiB)
_MAX_TM = 2048                           # diminishing returns beyond this


def _round_up(a, b):
    return ((a + b - 1) // b) * b


def _pick_tm(n, in_fp, out_fp, x_itemsize):
    """Largest row tile that fits the VMEM buffer budget (double-buffered x/out,
    resident double-buffered weight), rounded to sublanes, keeping >= 2 grid steps."""
    fixed = 2 * in_fp * out_fp * x_itemsize + 2 * out_fp * 4       # weight + bias
    per_row = 2 * (in_fp * x_itemsize + out_fp * 4)                # x tile + f32 out tile
    avail = max(_VMEM_BUFFER_BUDGET - fixed, per_row * 8)
    tm = avail // per_row
    tm = min(tm, _MAX_TM)
    # Keep at least two grid steps so the second TensorCore (v7x) is not idle.
    half_rows = -(-n // 2)
    tm = min(tm, _round_up(max(half_rows, 8), 8))
    tm = max(8, (tm // 8) * 8)
    return int(tm)


def _siren_kernel(x_ref, w_ref, b_ref, o_ref, *, apply_sin):
    # x_ref: (tm, in_fp), w_ref: (in_fp, out_fp), b_ref: (1, out_fp), o_ref: (tm, out_fp)
    y = jnp.dot(x_ref[...], w_ref[...], preferred_element_type=jnp.float32)
    y = y + b_ref[...]                       # broadcast (1, out_fp) over rows
    if apply_sin:
        y = jnp.sin(y)                       # w0 already folded into W/b
    o_ref[...] = y.astype(o_ref.dtype)


def siren_layer(x, weight, bias, *, w0=30.0, is_last=False, tm=None,
                use_bf16_matmul=False):
    """x: (N, in_f) f32; weight: (out_f, in_f) f32 (PyTorch layout); bias: (out_f,)."""
    n, in_f = x.shape
    out_f = weight.shape[0]

    # Fold w0 into the parameters (only for non-last layers: sin(w0*(xW.T+b))
    # == sin(x @ (w0*W).T + w0*b)). Glue ops stay in plain JAX, O(in_f*out_f).
    if is_last:
        w_eff = weight.T
        b_eff = bias
    else:
        w_eff = (jnp.float32(w0) * weight).T
        b_eff = jnp.float32(w0) * bias

    # Lane-dense padding of feature dims to multiples of 128; zero padding is
    # exact for the matmul / bias, and padded output columns are sliced off.
    in_fp = _round_up(in_f, 128)
    out_fp = _round_up(out_f, 128)

    x_dtype = jnp.bfloat16 if use_bf16_matmul else jnp.float32
    x_itemsize = jnp.dtype(x_dtype).itemsize

    if tm is None:
        tm = _pick_tm(n, in_fp, out_fp, x_itemsize)
    else:
        tm = max(8, (int(tm) // 8) * 8)
    n_p = _round_up(n, tm)

    x_p = jnp.pad(x, ((0, n_p - n), (0, in_fp - in_f))).astype(x_dtype)
    w_p = jnp.pad(w_eff, ((0, in_fp - in_f), (0, out_fp - out_f))).astype(x_dtype)
    b_p = jnp.pad(b_eff, (0, out_fp - out_f)).reshape(1, out_fp).astype(jnp.float32)

    kernel = functools.partial(_siren_kernel, apply_sin=not is_last)

    cost = pl.CostEstimate(
        flops=2 * n_p * in_fp * out_fp,
        transcendentals=0 if is_last else n_p * out_fp,
        bytes_accessed=x_itemsize * (n_p * in_fp + in_fp * out_fp)
        + 4 * (n_p * out_fp + out_fp),
    )

    out_p = pl.pallas_call(
        kernel,
        out_shape=jax.ShapeDtypeStruct((n_p, out_fp), jnp.float32),
        grid_spec=pltpu.PrefetchScalarGridSpec(
            num_scalar_prefetch=0,
            grid=(n_p // tm,),
            in_specs=[
                pl.BlockSpec((tm, in_fp), lambda i: (i, 0)),      # x row tile
                pl.BlockSpec((in_fp, out_fp), lambda i: (0, 0)),  # resident weight
                pl.BlockSpec((1, out_fp), lambda i: (0, 0)),      # resident bias
            ],
            out_specs=pl.BlockSpec((tm, out_fp), lambda i: (i, 0)),
        ),
        compiler_params=pltpu.CompilerParams(
            dimension_semantics=("parallel",),
            vmem_limit_bytes=_VMEM_LIMIT_BYTES,
        ),
        cost_estimate=cost,
    )(x_p, w_p, b_p)

    return out_p[:n, :out_f]


def init_siren_params(key, in_f, out_f, *, w0=30.0, is_first=False):
    """Deterministic init mirroring SirenLayer.init_weights + PyTorch Linear bias init."""
    kw, kb = jax.random.split(key)
    b_bound = (1.0 / in_f) if is_first else (np.sqrt(6.0 / in_f) / w0)
    weight = jax.random.uniform(
        kw, (out_f, in_f), dtype=jnp.float32, minval=-b_bound, maxval=b_bound
    )
    # nn.Linear default bias init: U(-1/sqrt(in_f), 1/sqrt(in_f))
    bias_bound = 1.0 / np.sqrt(in_f)
    bias = jax.random.uniform(
        kb, (out_f,), dtype=jnp.float32, minval=-bias_bound, maxval=bias_bound
    )
    return weight, bias


if __name__ == "__main__":
    key = jax.random.PRNGKey(0)
    k_x, k_p = jax.random.split(key)

    # Small, INR-like shapes: coordinate inputs (in_f=3), narrow hidden width,
    # row count NOT a multiple of 8/128 to exercise all padding paths.
    N, IN_F, OUT_F = 100, 3, 48
    W0 = 30.0
    IS_FIRST = True
    IS_LAST = False

    x = jax.random.uniform(k_x, (N, IN_F), dtype=jnp.float32, minval=-1.0, maxval=1.0)
    weight, bias = init_siren_params(k_p, IN_F, OUT_F, w0=W0, is_first=IS_FIRST)

    out = siren_layer(x, weight, bias, w0=W0, is_last=IS_LAST)
    out = jax.block_until_ready(out)

    # Pure-JAX reference check (hidden layer: sin(w0 * (x @ W.T + b))).
    y_ref = x @ weight.T + bias
    ref = jnp.sin(W0 * y_ref)
    np.testing.assert_allclose(np.asarray(out), np.asarray(ref), atol=1e-4, rtol=1e-5)

    # Also exercise the is_last (identity / no-sin) path.
    out_last = siren_layer(x, weight, bias, w0=W0, is_last=True)
    out_last = jax.block_until_ready(out_last)
    np.testing.assert_allclose(
        np.asarray(out_last), np.asarray(y_ref), atol=1e-4, rtol=1e-5
    )

    print("KERNEL_OK")
</pallas_src>

<mosaic_0001>
module attributes {stable_mosaic.version = 11 : i64} {
  func.func @_siren_kernel(%arg0: i32, %arg1: memref<56x128xf32, #tpu.memory_space<vmem>>, %arg2: memref<128x128xf32, #tpu.memory_space<vmem>>, %arg3: memref<1x128xf32, #tpu.memory_space<vmem>>, %arg4: memref<56x128xf32, #tpu.memory_space<vmem>>) attributes {dimension_semantics = [#tpu.dimension_semantics<parallel>], iteration_bounds = array<i64: 2>, scalar_prefetch = 0 : i64, scratch_operands = 0 : i64, tpu.core_type = #tpu.core_type<tc>, window_params = [{transform_indices = @transform_0, window_bounds = array<i64: 56, 128>}, {pipeline_mode = #tpu.pipeline_mode<synchronous>, transform_indices = @transform_1, window_bounds = array<i64: 128, 128>}, {pipeline_mode = #tpu.pipeline_mode<synchronous>, transform_indices = @transform_2, window_bounds = array<i64: 1, 128>}, {transform_indices = @transform_3, window_bounds = array<i64: 56, 128>}]} {
    %c0 = arith.constant 0 : index
    %c0_0 = arith.constant 0 : index
    %0 = vector.load %arg1[%c0, %c0_0] : memref<56x128xf32, #tpu.memory_space<vmem>>, vector<56x128xf32>
    %c0_1 = arith.constant 0 : index
    %c0_2 = arith.constant 0 : index
    %1 = vector.load %arg2[%c0_1, %c0_2] : memref<128x128xf32, #tpu.memory_space<vmem>>, vector<128x128xf32>
    %cst = arith.constant dense<0.000000e+00> : vector<56x128xf32>
    %2 = tpu.matmul %0, %1, %cst {dimension_numbers = #tpu.dot_dimension_numbers<[1], [0], [0], [1], [0, 0, 1, 1], [], []>} : vector<56x128xf32>, vector<128x128xf32>, vector<56x128xf32> -> vector<56x128xf32>
    %c0_3 = arith.constant 0 : index
    %c0_4 = arith.constant 0 : index
    %3 = vector.load %arg3[%c0_3, %c0_4] : memref<1x128xf32, #tpu.memory_space<vmem>>, vector<1x128xf32>
    %4 = vector.broadcast %3 : vector<1x128xf32> to vector<56x128xf32>
    %5 = arith.addf %2, %4 : vector<56x128xf32>
    %6 = math.sin %5 : vector<56x128xf32>
    %c0_5 = arith.constant 0 : index
    %c0_6 = arith.constant 0 : index
    %7 = vector.load %arg4[%c0_5, %c0_6] : memref<56x128xf32, #tpu.memory_space<vmem>>, vector<56x128xf32>
    tpu.vector_store %arg4[%c0_5, %c0_6], %6 {strides = array<i32>} : memref<56x128xf32, #tpu.memory_space<vmem>>, vector<56x128xf32>,
    return
  }
  func.func @transform_0(%arg0: i32) -> (i32, i32) {
    %c0_i32 = arith.constant 0 : i32
    %c0_i32_0 = arith.constant 0 : i32
    return %arg0, %c0_i32 : i32, i32
  }
  func.func @transform_1(%arg0: i32) -> (i32, i32) {
    %c0_i32 = arith.constant 0 : i32
    %c0_i32_0 = arith.constant 0 : i32
    %c0_i32_1 = arith.constant 0 : i32
    return %c0_i32, %c0_i32_0 : i32, i32
  }
  func.func @transform_2(%arg0: i32) -> (i32, i32) {
    %c0_i32 = arith.constant 0 : i32
    %c0_i32_0 = arith.constant 0 : i32
    %c0_i32_1 = arith.constant 0 : i32
    return %c0_i32, %c0_i32_0 : i32, i32
  }
  func.func @transform_3(%arg0: i32) -> (i32, i32) {
    %c0_i32 = arith.constant 0 : i32
    %c0_i32_0 = arith.constant 0 : i32
    return %arg0, %c0_i32 : i32, i32
  }
}

</mosaic_0001>

<bundles_post_ra>
// kernel: tpu_custom_call.1
= control target key start
LH: loop header
LB: loop body
LE: loop exit
PB: predicated region body
PF: predicated region fallthrough
CT: control target
= control target key end

     0   :  { %8 = vsyncpa [#allocation3], 0  ;;  %s2705_s0 = inlined_call_operand.hbm [shape: f32[112,128], index: 0, kind: input, shape index: {}]   ;;  %s2706_s1 = inlined_call_operand.hbm [shape: f32[128,128], index: 1, kind: input, shape index: {}]   ;;  %s2707_s2 = inlined_call_operand.vmem [shape: f32[1,128], index: 2, kind: input, shape index: {}]   ;;  %s2708_s3 = inlined_call_operand.hbm [shape: f32[112,128], index: 3, kind: output, shape index: {}]  }
   0x1   :  { %10 = vsyncpa [#allocation3 + $0x1], 0 }
   0x2   :  { %11 = vsyncpa [#allocation6], 0 }
   0x3   :  { %12 = vsyncpa [#allocation4], 0 }
   0x4   :  { %14 = vsyncpa [#allocation4 + $0x1], 0  ;;  %s1783_s12 = smov 0   ;;  %s1785_s13 = smov 0  }
   0x5   :  { %s1787_s14 = smov 0   ;;  %s1789_s15 = smov 0  }
   0x6 LB: > { %s1804_s16 = sadd.s32 4294967295, %s1749_s15   ;;  %s1466_s17 = sadd.s32 4294967294, %s1749_s15   ;;  %s1749_s15 = sphi %s1789_s15, %s2730_s15   ;;  %s1745_s14 = sphi %s1787_s14, %s2729_s14   ;;  %s1741_s13 = sphi %s1785_s13, %s2728_s13   ;;  %s1737_s12 = sphi %s1783_s12, %s2727_s12  }
   0x7   : > { %p40_p0 = scmp.ne.s32.totalorder %s1741_s13, %s1737_s12  ;;  %p41_p1 = scmp.eq.s32.totalorder %s1804_s16, 0 }
   0x8   : > { %p106_p2 = scmp.eq.s32.totalorder %s1804_s16, 1  ;;  %p112_p3 = scmp.eq.s32.totalorder %s1466_s17, 1 }
   0x9   : > { %p1813_p4 = por %p41_p1, %p40_p0  ;;  %p1467_p5 = scmp.ge.s32.totalorder %s1749_s15, 1 }
   0xa   : > { %p1818_p6 = por %p112_p3, %p40_p0  ;;  %p119_p7 = scmp.lt.s32.totalorder %s1749_s15, 3 }
   0xb   : > { %s130_s22 = sshll.u32 %s2706_s1, 4  ;;  %s1751_s24 = smov [#allocation5]   ;;  %s131_s22 = int_to_ptr.hbm [resolvable:$true] %s130_s22 }
   0xc   : > { %p1826_p8 = pnand %p1467_p5, %p119_p7  ;;  %s132_s25 = sshll.u32 %s1751_s24, 4  ;;  %s133_s25 = int_to_ptr.vmem [resolvable:$true] %s132_s25 }
   0xd   : > { %s1836_s26 = sadd.s32 1, %s1749_s15   ;;  %s2709_s27 = smov 128  }
   0xe   : > { %p1557_p9 = pneg %p1826_p8  ;;  %s1753_s28 = smov 8  }
   0xf   : > { %s24_s29 = ssub.s32 %s1749_s15, %s1836_s26  ;;  %s27_s30 = sadd.s32 1, %s1745_s14 }
  0x10   : > { %p1558_p10 = pnand %p1557_p9, %p41_p1  ;;  %p25_p12 = scmp.eq.s32.totalorder %s24_s29, 0 }
  0x11   : > { %p34_p13 = scmp.ne.s32.totalorder %s1745_s14, %s1741_s13  ;;  %p35_p0 = scmp.eq.s32.totalorder %s1749_s15, 0 }
  0x12   : > { %1560 = dma.hbm_to_vmem [thread:$0]  (!%p1558_p10), %s131_s22, 2048, %s133_s25, [#allocation6], %s2709_s27, %s2709_s27, %s1753_s28  }
  0x13   : > { %p1570_p3 = scmp.lt.s32.totalorder %s1749_s15, 2  ;;  %p36_p5 = por %p35_p0, %p34_p13 }
  0x14   : > { %s1849_s4 = scalar_select %p25_p12, %s1745_s14, %s27_s30  }
  0x15   : > { %p1853_p7 = por %p106_p2, %p34_p13  ;;  %s149_s6 = sand.u32 1, %s1745_s14  }
  0x16   : > { %s1497_s7 = smul.u32 56, %s1749_s15  ;;  %p1862_p9 = pnand %p1570_p3, %p36_p5 }
  0x17   : > { %s1547_s8 = smul.u32 56, %s149_s6  ;;  %s150_s24 = scalar_lea.sflag [#allocation3], %s149_s6 }
  0x18   : > { %s158_s11 = scalar_lea.hbm %s2705_s0, %s1497_s7  ;;  %p1653_p10 = pneg %p1862_p9 }
  0x19   : > { %s159_s20 = sshll.u32 %s158_s11, 4  ;;  %s153_s21 = scalar_lea.vmem [#allocation2], %s1547_s8  ;;  %s160_s20 = int_to_ptr.hbm [resolvable:$true] %s159_s20 }
  0x1a   : > { %s161_s22 = sshll.u32 %s153_s21, 4  ;;  %s1649_s25 = sshra.s32 %s160_s20, 4  ;;  %s162_s22 = int_to_ptr.vmem [resolvable:$true] %s161_s22  ;;  %s1650_s25 = int_to_ptr.hbm [resolvable:$true] %s1649_s25 }
  0x1b   : > { %s1651_s29 = scalar_lea.hbm %s1650_s25, 56  ;;  %s1656_s9 = scalar_lea.hbm %s2705_s0, 112 }
  0x1c   : > { %p1652_p2 = scmp.ne.s32.totalorder %s1650_s25, %s1651_s29  ;;  %p1657_p0 = scmp.lt.s32.totalorder %s1650_s25, %s2705_s0 }
  0x1d   : > { %p1658_p3 = scmp.lt.s32.totalorder %s1656_s9, %s1651_s29 }
  0x1e   : > { %p1654_p12 = pnand %p1653_p10, %p1652_p2 }
  0x1f   : > { %p1659_p5 = por %p1658_p3, %p1657_p0 }
  0x20   : > { %p1655_p13 = pneg %p1654_p12 }
  0x22   : > { %p1660_p11 = pnand %p1659_p5, %p1655_p13 }
  0x24   : > { %1663 = shalt.err (!%p1660_p11)
}
  0x25   : > { %s2715_s6 = smov 128   ;;  %173 = sbr.rel (%p1826_p8) target bundleno = 513 (0x201), region = 32 }
  0x26   : > { %1564 = dma.hbm_to_vmem [thread:$0]  (!%p1862_p9), %s160_s20, 896, %s162_s22, %s150_s24, %s2715_s6, %s2715_s6, %s1753_s28  }
  0x27   : > { %s1882_s8 = sand.u32 (!%p1826_p8), 1, %s1741_s13  }
  0x28   : > { %s1548_s27 = smul.u32 (!%p1826_p8), 56, %s1882_s8  ;;  %s176_s11 = scalar_lea.sflag (!%p1826_p8), [#allocation3], %s1882_s8 }
  0x2a   : > { %s1888_s21 = scalar_lea.vmem [#allocation2], %s1548_s27 }
  0x2b   : > { %1724 = dma.done.wait (%p1813_p4), %s176_s11, 896  }
  0x2c   : > { %1726 = vsyncadd (%p1813_p4), %s176_s11, 4294966400 }
  0x2d   : > { %1728 = dma.done.wait (%p41_p1), [#allocation6], 2048  }
  0x2e   : > { %1730 = vsyncadd (%p41_p1), [#allocation6], 4294965248  ;;  %v232_v0 = vld [vmem:[#allocation5 + $0x78] sm:$0xff]  ;;  %v231_v1 = vld [vmem:[#allocation5 + $0x70] sm:$0xff]  ;;  %v1754_v52 = vmov 683565275  }
  0x2f   : > { %237 = vmatpush.msra.mxu0 %v232_v0  ;;  %1499 = vmatpush.msra.mxu1 %v232_v0  ;;  %v230_v2 = vld [vmem:[#allocation5 + $0x68] sm:$0xff]  ;;  %v229_v3 = vld [vmem:[#allocation5 + $0x60] sm:$0xff]  ;;  %v228_v4 = vld [vmem:[#allocation5 + $0x58] sm:$0xff]  ;;  %v1755_v54 = vmov 2475754826   ;;  %s2219_s28 = scalar_lea.vmem [#allocation7], %s1548_s27 }
  0x30   : > { %1500 = vmatpush.msra.mxu2 %v232_v0  ;;  %1501 = vmatpush.msra.mxu3 %v232_v0  ;;  %v227_v5 = vld [vmem:[#allocation5 + $0x50] sm:$0xff]  ;;  %v226_v6 = vld [vmem:[#allocation5 + $0x48] sm:$0xff]  ;;  %v225_v7 = vld [vmem:[#allocation5 + $0x40] sm:$0xff]  ;;  %v1756_v56 = vmov 2131351028   ;;  %s1498_s22 = smul.u32 56, %s1804_s16 }
  0x31   : > { %238 = vmatpush.msra.mxu0 %v231_v1  ;;  %1502 = vmatpush.msra.mxu1 %v231_v1  ;;  %v224_v8 = vld [vmem:[#allocation5 + $0x38] sm:$0xff]  ;;  %v223_v9 = vld [vmem:[#allocation5 + $0x30] sm:$0xff]  ;;  %v222_v10 = vld [vmem:[#allocation5 + $0x28] sm:$0xff]  ;;  %v1757_v58 = vmov 2102212464   ;;  %s1380_s30 = sshll.u32 %s2219_s28, 4  ;;  %s1381_s30 = int_to_ptr.vmem [resolvable:$true] %s1380_s30 }
  0x32   : > { %1503 = vmatpush.msra.mxu2 %v231_v1  ;;  %1504 = vmatpush.msra.mxu3 %v231_v1  ;;  %v221_v11 = vld [vmem:[#allocation5 + $0x20] sm:$0xff]  ;;  %v220_v12 = vld [vmem:[#allocation5 + $0x18] sm:$0xff]  ;;  %v219_v13 = vld [vmem:[#allocation5 + $0x10] sm:$0xff]  ;;  %v1758_v60 = vmov 920167782   ;;  %s1379_s29 = scalar_lea.hbm %s2708_s3, %s1498_s22  ;;  %s1368_s16 = scalar_lea.sflag [#allocation4], %s1882_s8 }
  0x33   : > { %239 = vmatpush.msra.mxu0 %v230_v2  ;;  %1505 = vmatpush.msra.mxu1 %v230_v2  ;;  %v218_v14 = vld [vmem:[#allocation5 + $0x8] sm:$0xff]  ;;  %v217_v15 = vld [vmem:[#allocation5] sm:$0xff]  ;;  %v215_v19 = vld [vmem:[%s1888_s21 + $0x28] sm:$0xff]  ;;  %s1382_s7 = sshll.u32 %s1379_s29, 4  ;;  %s1699_s11 = scalar_lea.hbm %s2708_s3, 112  ;;  %s1383_s7 = int_to_ptr.hbm [resolvable:$true] %s1382_s7 }
  0x34   : > { %1506 = vmatpush.msra.mxu2 %v230_v2  ;;  %1507 = vmatpush.msra.mxu3 %v230_v2  ;;  %v210_v16 = vld [vmem:[%s1888_s21] sm:$0xff]  ;;  %v212_v17 = vld [vmem:[%s1888_s21 + $0x10] sm:$0xff]  ;;  %v213_v18 = vld [vmem:[%s1888_s21 + $0x18] sm:$0xff]  ;;  %s1693_s9 = sshra.s32 %s1383_s7, 4  ;;  %s1694_s9 = int_to_ptr.hbm [resolvable:$true] %s1693_s9 }
  0x35   : > { %240 = vmatpush.msra.mxu0 %v229_v3  ;;  %1508 = vmatpush.msra.mxu1 %v229_v3  ;;  %v211_v20 = vld [vmem:[%s1888_s21 + $0x8] sm:$0xff]  ;;  %v214_v21 = vld [vmem:[%s1888_s21 + $0x20] sm:$0xff]  ;;  %v216_v22 = vld [vmem:[%s1888_s21 + $0x30] sm:$0xff]  ;;  %s1695_s10 = scalar_lea.hbm %s1694_s9, 56  ;;  %p1700_p11 = scmp.lt.s32.totalorder %s1694_s9, %s2708_s3 }
  0x36   : > { %1509 = vmatpush.msra.mxu2 %v229_v3  ;;  %1510 = vmatpush.msra.mxu3 %v229_v3  ;;  %v1908_v23 = vld [vmem:[%s2707_s2] ss:$0 sm:$0xff]  ;;  %p1696_p1 = scmp.ne.s32.totalorder %s1694_s9, %s1695_s10  ;;  %p1701_p9 = scmp.lt.s32.totalorder %s1699_s11, %s1695_s10 }
  0x37   : > { %241 = vmatpush.msra.mxu0 %v228_v4  ;;  %1511 = vmatpush.msra.mxu1 %v228_v4 }
  0x38   : > { %1512 = vmatpush.msra.mxu2 %v228_v4  ;;  %1513 = vmatpush.msra.mxu3 %v228_v4  ;;  %p1697_p4 = pnand %p1696_p1, %p1853_p7  ;;  %p1702_p2 = por %p1701_p9, %p1700_p11 }
  0x39   : > { %242 = vmatpush.msra.mxu0 %v227_v5  ;;  %1514 = vmatpush.msra.mxu1 %v227_v5 }
  0x3a   : > { %1515 = vmatpush.msra.mxu2 %v227_v5  ;;  %1516 = vmatpush.msra.mxu3 %v227_v5  ;;  %v1759_v5 = vmov 1326507024   ;;  %p1698_p8 = pneg %p1697_p4 }
  0x3b   : > { %243 = vmatpush.msra.mxu0 %v226_v6  ;;  %1517 = vmatpush.msra.mxu1 %v226_v6 }
  0x3c   : > { %1518 = vmatpush.msra.mxu2 %v226_v6  ;;  %1519 = vmatpush.msra.mxu3 %v226_v6  ;;  %p1703_p10 = pnand %p1702_p2, %p1698_p8 }
  0x3d   : > { %244 = vmatpush.msra.mxu0 %v225_v7  ;;  %1520 = vmatpush.msra.mxu1 %v225_v7 }
  0x3e   : > { %1521 = vmatpush.msra.mxu2 %v225_v7  ;;  %1522 = vmatpush.msra.mxu3 %v225_v7 }
  0x3f   : > { %245 = vmatpush.msra.mxu0 %v224_v8  ;;  %1523 = vmatpush.msra.mxu1 %v224_v8 }
  0x40   : > { %1524 = vmatpush.msra.mxu2 %v224_v8  ;;  %1525 = vmatpush.msra.mxu3 %v224_v8 }
  0x41   : > { %246 = vmatpush.msra.mxu0 %v223_v9  ;;  %1526 = vmatpush.msra.mxu1 %v223_v9 }
  0x42   : > { %1527 = vmatpush.msra.mxu2 %v223_v9  ;;  %1528 = vmatpush.msra.mxu3 %v223_v9 }
  0x43   : > { %247 = vmatpush.msra.mxu0 %v222_v10  ;;  %1529 = vmatpush.msra.mxu1 %v222_v10 }
  0x44   : > { %1530 = vmatpush.msra.mxu2 %v222_v10  ;;  %1531 = vmatpush.msra.mxu3 %v222_v10 }
  0x45   : > { %248 = vmatpush.msra.mxu0 %v221_v11  ;;  %1532 = vmatpush.msra.mxu1 %v221_v11 }
  0x46   : > { %1533 = vmatpush.msra.mxu2 %v221_v11  ;;  %1534 = vmatpush.msra.mxu3 %v221_v11 }
  0x47   : > { %249 = vmatpush.msra.mxu0 %v220_v12  ;;  %1535 = vmatpush.msra.mxu1 %v220_v12 }
  0x48   : > { %1536 = vmatpush.msra.mxu2 %v220_v12  ;;  %1537 = vmatpush.msra.mxu3 %v220_v12 }
  0x49   : > { %250 = vmatpush.msra.mxu0 %v219_v13  ;;  %1538 = vmatpush.msra.mxu1 %v219_v13 }
  0x4a   : > { %1539 = vmatpush.msra.mxu2 %v219_v13  ;;  %1540 = vmatpush.msra.mxu3 %v219_v13 }
  0x4b   : > { %251 = vmatpush.msra.mxu0 %v218_v14  ;;  %1541 = vmatpush.msra.mxu1 %v218_v14 }
  0x4c   : > { %1542 = vmatpush.msra.mxu2 %v218_v14  ;;  %1543 = vmatpush.msra.mxu3 %v218_v14 }
  0x4d   : > { %252 = vmatpush.msra.mxu0 %v217_v15  ;;  %1544 = vmatpush.msra.mxu1 %v217_v15 }
  0x4e   : > { %1545 = vmatpush.msra.mxu2 %v217_v15  ;;  %1546 = vmatpush.msra.mxu3 %v217_v15 }
  0x4f   : > { %253 = vmatmul.f32.vlgmr.msra.gmra.mxu0 %v210_v16  ;;  %259 = vmatmul.f32.vlgmr.msra.gmra.mxu1 %v212_v17 }
  0x50   : > { %262 = vmatmul.f32.vlgmr.msra.gmra.mxu2 %v213_v18  ;;  %268 = vmatmul.f32.vlgmr.msra.gmra.mxu3 %v215_v19 }
  0x57   : > { %256 = vmatmul.f32.gmra.mxu0 %v211_v20 }
  0x58   : > { %265 = vmatmul.f32.gmra.mxu2 %v214_v21  ;;  %271 = vmatmul.f32.gmra.mxu3 %v216_v22 }
  0xcc   : > { %v254_v24 = vpop.f32.mrf.mxu0  ;;  %v260_v25 = vpop.f32.mrf.mxu1 }
  0xcd   : > { %v1911_v26 = vadd.f32 %v1908_v23, %v254_v24  ;;  %v1914_v27 = vadd.f32 %v1908_v23, %v260_v25 }
  0xcf   : > { %v275_v28 = vand.u32 2147483647, %v1911_v26  ;;  %v278_v29 = vand.u32 2139095040, %v1911_v26  ;;  %v585_v30 = vand.u32 2147483647, %v1914_v27  ;;  %v588_v31 = vand.u32 2139095040, %v1914_v27 }
  0xd1   : > { %v279_v32 = vshrl.u32 %v278_v29, 23  ;;  %v282_v33 = vand.u32 8388607, %v275_v28  ;;  %v589_v34 = vshrl.u32 %v588_v31, 23  ;;  %v592_v35 = vand.u32 8388607, %v585_v30 }
  0xd3   : > { %v1473_v36 = vadd.s32 4294967169, %v279_v32  ;;  %v283_v37 = vor.u32 8388608, %v282_v33  ;;  %v1479_v38 = vadd.s32 4294967169, %v589_v34  ;;  %v593_v40 = vor.u32 8388608, %v592_v35  ;;  %v263_v42 = vpop.f32.mrf.mxu2 }
  0xd4   : > { %v1927_v47 = vadd.f32 %v1908_v23, %v263_v42 }
  0xd5   : > { %v285_v39 = vadd.s32 1, %v1473_v36  ;;  %v595_v41 = vadd.s32 1, %v1479_v38  ;;  %v1924_v44 = vshll.u32 %v283_v37, 8  ;;  %v1933_v50 = vshll.u32 %v593_v40, 8 }
  0xd6   : > { %v743_v3 = vand.u32 2139095040, %v1927_v47 }
  0xd7   : > { %vm286_vm0 = vcmp.gt.s32.totalorder %v285_v39, 0  ;;  %vm596_vm1 = vcmp.gt.s32.totalorder %v595_v41, 0  ;;  %v324_v62 = vand.u32 65535, %v1924_v44  ;;  %v325_v63 = vshrl.u32 %v1924_v44, 16 }
  0xd8   : > { %v287_v43 = vsel %vm286_vm0, %v285_v39, 0  ;;  %v597_v46 = vsel %vm596_vm1, %v595_v41, 0  ;;  %v1955_v13 = vand.u32 65535, %v1933_v50  ;;  %v1986_v33 = vshrl.u32 %v1933_v50, 16 }
  0xd9   : > { %v289_v45 = vand.u32 31, %v287_v43  ;;  %v1929_v48 = vshrl.u32 %v287_v43, 5  ;;  %v1931_v49 = vand.u32 31, %v597_v46  ;;  %v1992_v40 = vshrl.u32 %v597_v46, 5 }
  0xdb   : > { %v290_v51 = vsub.s32 32, %v289_v45  ;;  %v292_v53 = vshll.u32 %v1754_v52, %v289_v45  ;;  %v295_v55 = vshll.u32 %v1755_v54, %v289_v45  ;;  %v298_v57 = vshll.u32 %v1756_v56, %v289_v45 }
  0xdc   : > { %v301_v59 = vshll.u32 %v1757_v58, %v289_v45  ;;  %v304_v61 = vshll.u32 %v1758_v60, %v289_v45  ;;  %vm307_vm2 = vcmp.lt.s32.totalorder %v1929_v48, 1  ;;  %vm310_vm3 = vcmp.lt.s32.totalorder %v1929_v48, 4 }
  0xdd   : > { %v293_v0 = vshrl.u32 %v1755_v54, %v290_v51  ;;  %v296_v1 = vshrl.u32 %v1756_v56, %v290_v51  ;;  %v299_v2 = vshrl.u32 %v1757_v58, %v290_v51  ;;  %v302_v4 = vshrl.u32 %v1758_v60, %v290_v51 }
  0xde   : > { %v305_v6 = vshrl.u32 %v1759_v5, %v290_v51  ;;  %v1951_v10 = vsub.s32 32, %v1931_v49  ;;  %vm309_vm4 = vcmp.lt.s32.totalorder %v1929_v48, 3  ;;  %v291_v14 = vshrl.u32 %v1754_v52, %v290_v51 }
  0xdf   : > { %v294_v7 = vor.u32 %v293_v0, %v292_v53  ;;  %v297_v8 = vor.u32 %v296_v1, %v295_v55  ;;  %v300_v9 = vor.u32 %v299_v2, %v298_v57  ;;  %v303_v11 = vor.u32 %v302_v4, %v301_v59 }
  0xe0   : > { %v306_v12 = vor.u32 %v305_v6, %v304_v61  ;;  %vm308_vm5 = vcmp.lt.s32.totalorder %v1929_v48, 2  ;;  %v602_v19 = vshll.u32 %v1754_v52, %v1931_v49  ;;  %v605_v20 = vshll.u32 %v1755_v54, %v1931_v49 }
  0xe1   : > { %v315_v15 = vsel %vm307_vm2, %v294_v7, %v297_v8  ;;  %v319_v16 = vsel %vm307_vm2, %v297_v8, %v300_v9  ;;  %v316_v17 = vsel %vm310_vm3, %v303_v11, 920167782  ;;  %v312_v21 = vsel %vm310_vm3, %v300_v9, 2102212464 }
  0xe2   : > { %v320_v18 = vsel %vm310_vm3, %v306_v12, 1326507024  ;;  %v317_v22 = vsel %vm309_vm4, %v300_v9, %v316_v17  ;;  %v603_v25 = vshrl.u32 %v1755_v54, %v1951_v10  ;;  %v606_v32 = vshrl.u32 %v1756_v56, %v1951_v10 }
  0xe3   : > { %v321_v24 = vsel %vm309_vm4, %v303_v11, %v320_v18  ;;  %v318_v29 = vsel %vm308_vm5, %v315_v15, %v317_v22  ;;  %v311_v38 = vsel %vm307_vm2, %v291_v14, %v294_v7  ;;  %v313_v39 = vsel %vm309_vm4, %v297_v8, %v312_v21 }
  0xe4   : > { %v322_v31 = vsel %vm308_vm5, %v319_v16, %v321_v24  ;;  %v348_v36 = vand.u32 65535, %v318_v29  ;;  %v349_v37 = vshrl.u32 %v318_v29, 16  ;;  %v1994_v41 = vor.u32 %v603_v25, %v602_v19 }
  0xe5   : > { %v326_v34 = vand.u32 65535, %v322_v31  ;;  %v327_v35 = vshrl.u32 %v322_v31, 16  ;;  %v1996_v45 = vor.u32 %v606_v32, %v605_v20  ;;  %v608_v51 = vshll.u32 %v1756_v56, %v1931_v49 }
  0xe6   : > { %v351_v55 = vmul.u32 %v349_v37, %v324_v62  ;;  %v352_v57 = vmul.u32 %v348_v36, %v325_v63  ;;  %v609_v59 = vshrl.u32 %v1757_v58, %v1951_v10  ;;  %v350_v1 = vmul.u32 %v348_v36, %v324_v62 }
  0xe7   : > { %v329_v42 = vmul.u32 %v327_v35, %v324_v62  ;;  %v330_v43 = vmul.u32 %v326_v34, %v325_v63  ;;  %v328_v53 = vmul.u32 %v326_v34, %v324_v62  ;;  %v331_v61 = vmul.u32 %v327_v35, %v325_v63 }
  0xe8   : > { %v353_v46 = vmul.u32 %v349_v37, %v325_v63  ;;  %v354_v7 = vshll.u32 %v351_v55, 16  ;;  %v356_v9 = vshll.u32 %v352_v57, 16  ;;  %v611_v11 = vshll.u32 %v1757_v58, %v1931_v49 }
  0xe9   : > { %v332_v0 = vshll.u32 %v329_v42, 16  ;;  %v333_v2 = vshrl.u32 %v329_v42, 16  ;;  %v334_v4 = vshll.u32 %v330_v43, 16  ;;  %v335_v6 = vshrl.u32 %v330_v43, 16 }
  0xea   : > { %v1760_v12 = vmov 0   ;;  %vm358_vm7 = vc.u32 %v350_v1, %v354_v7  ;;  %v360_v15 = vadd.s32 %v354_v7, %v350_v1  ;;  %v612_v16 = vshrl.u32 %v1758_v60, %v1951_v10 }
  0xeb   : > { %vm336_vm6 = vc.u32 %v328_v53, %v332_v0  ;;  %v338_v8 = vadd.s32 %v332_v0, %v328_v53  ;;  %v359_v63 = vsel %vm358_vm7, 1, %v1760_v12  ;;  %v614_v17 = vshll.u32 %v1758_v60, %v1931_v49 }
  0xec   : > { %v337_v14 = vsel %vm336_vm6, 1, %v1760_v12  ;;  %v361_v19 = vadd.s32 %v359_v63, %v353_v46  ;;  %vm362_vm9 = vc.u32 %v360_v15, %v356_v9  ;;  %v610_v20 = vor.u32 %v609_v59, %v608_v51 }
  0xed   : > { %v339_v62 = vadd.s32 %v337_v14, %v331_v61  ;;  %vm340_vm8 = vc.u32 %v338_v8, %v334_v4  ;;  %v363_v22 = vsel %vm362_vm9, 1, %v1760_v12  ;;  %v613_v24 = vor.u32 %v612_v16, %v611_v11 }
  0xee   : > { %v341_v18 = vsel %vm340_vm8, 1, %v1760_v12  ;;  %v615_v25 = vshrl.u32 %v1759_v5, %v1951_v10  ;;  %v355_v29 = vshrl.u32 %v351_v55, 16  ;;  %v365_v31 = vadd.s32 %v363_v22, %v361_v19 }
  0xef   : > { %v343_v21 = vadd.s32 %v341_v18, %v339_v62  ;;  %vm617_vm10 = vcmp.lt.s32.totalorder %v1992_v40, 1  ;;  %vm619_vm11 = vcmp.lt.s32.totalorder %v1992_v40, 3  ;;  %vm618_vm12 = vcmp.lt.s32.totalorder %v1992_v40, 2 }
  0xf0   : > { %v616_v49 = vor.u32 %v615_v25, %v614_v17  ;;  %vm620_vm13 = vcmp.lt.s32.totalorder %v1992_v40, 4  ;;  %v357_v34 = vshrl.u32 %v352_v57, 16  ;;  %v366_v35 = vadd.s32 %v365_v31, %v355_v29 }
  0xf1   : > { %v344_v32 = vadd.s32 %v343_v21, %v333_v2  ;;  %v625_v36 = vsel %vm617_vm10, %v1994_v41, %v1996_v45  ;;  %v626_v37 = vsel %vm620_vm13, %v613_v24, 920167782  ;;  %v2026_v43 = vadd.s32 %v360_v15, %v356_v9 }
  0xf2   : > { %v627_v51 = vsel %vm619_vm11, %v610_v20, %v626_v37  ;;  %v629_v53 = vsel %vm617_vm10, %v1996_v45, %v610_v20  ;;  %v314_v55 = vsel %vm308_vm5, %v311_v38, %v313_v39  ;;  %v367_v57 = vadd.s32 %v366_v35, %v357_v34 }
  0xf3   : > { %v2024_v42 = vadd.s32 %v344_v32, %v335_v6  ;;  %v628_v59 = vsel %vm618_vm12, %v625_v36, %v627_v51  ;;  %v630_v61 = vsel %vm620_vm13, %v616_v49, 1326507024  ;;  %v740_v38 = vand.u32 2147483647, %v1927_v47 }
  0xf4   : > { %v631_v0 = vsel %vm619_vm11, %v613_v24, %v630_v61  ;;  %v658_v1 = vand.u32 65535, %v628_v59  ;;  %v371_v46 = vadd.s32 1, %v367_v57  ;;  %v659_v48 = vshrl.u32 %v628_v59, 16 }
  0xf5   : > { %vm370_vm14 = vc.u32 %v2024_v42, %v2026_v43  ;;  %v632_v2 = vsel %vm618_vm12, %v629_v53, %v631_v0  ;;  %v368_v39 = vmul.u32 %v1924_v44, %v314_v55  ;;  %v744_v14 = vshrl.u32 %v743_v3, 23 }
  0xf6   : > { %v636_v4 = vand.u32 65535, %v632_v2  ;;  %v637_v6 = vshrl.u32 %v632_v2, 16  ;;  %v662_v7 = vmul.u32 %v658_v1, %v1986_v33  ;;  %v372_v8 = vsel %vm370_vm14, %v371_v46, %v367_v57 }
  0xf7   : > { %v660_v9 = vmul.u32 %v658_v1, %v1955_v13  ;;  %v661_v11 = vmul.u32 %v659_v48, %v1955_v13  ;;  %v373_v15 = vadd.s32 %v372_v8, %v368_v39  ;;  %v601_v44 = vshrl.u32 %v1754_v52, %v1951_v10 }
  0xf8   : > { %v638_v16 = vmul.u32 %v636_v4, %v1955_v13  ;;  %v639_v62 = vmul.u32 %v637_v6, %v1955_v13  ;;  %v640_v63 = vmul.u32 %v636_v4, %v1986_v33  ;;  %v622_v17 = vsel %vm620_vm13, %v610_v20, 2102212464 }
  0xf9   : > { %v664_v18 = vshll.u32 %v661_v11, 16  ;;  %v666_v19 = vshll.u32 %v662_v7, 16  ;;  %v374_v21 = vadd.s32 536870912, %v373_v15  ;;  %v663_v3 = vmul.u32 %v659_v48, %v1986_v33 }
  0xfa   : > { %v642_v22 = vshll.u32 %v639_v62, 16  ;;  %v644_v24 = vshll.u32 %v640_v63, 16  ;;  %v641_v25 = vmul.u32 %v637_v6, %v1986_v33  ;;  %v1482_v13 = vadd.s32 4294967169, %v744_v14 }
  0xfb   : > { %vm668_vm15 = vc.u32 %v660_v9, %v664_v18  ;;  %v670_v29 = vadd.s32 %v664_v18, %v660_v9  ;;  %v375_v31 = vshrl.u32 %v374_v21, 30  ;;  %v747_v34 = vand.u32 8388607, %v740_v38 }
  0xfc   : > { %vm646_vm0 = vc.u32 %v638_v16, %v642_v22  ;;  %v648_v32 = vadd.s32 %v642_v22, %v638_v16  ;;  %v669_v10 = vsel %vm668_vm15, 1, %v1760_v12  ;;  %v621_v33 = vsel %vm617_vm10, %v601_v44, %v1994_v41 }
  0xfd   : > { %v647_v49 = vsel %vm646_vm0, 1, %v1760_v12  ;;  %v671_v20 = vadd.s32 %v669_v10, %v663_v3  ;;  %vm672_vm1 = vc.u32 %v670_v29, %v666_v19  ;;  %v376_v35 = vshll.u32 %v375_v31, 30 }
  0xfe   : > { %v649_v36 = vadd.s32 %v647_v49, %v641_v25  ;;  %vm650_vm2 = vc.u32 %v648_v32, %v644_v24  ;;  %v623_v37 = vsel %vm619_vm11, %v1996_v45, %v622_v17  ;;  %v673_v53 = vsel %vm672_vm1, 1, %v1760_v12 }
  0xff   : > { %v651_v51 = vsel %vm650_vm2, 1, %v1760_v12  ;;  %v750_v55 = vadd.s32 1, %v1482_v13  ;;  %v377_v57 = vsub.s32 %v373_v15, %v376_v35  ;;  %v643_v59 = vshrl.u32 %v639_v62, 16 }
 0x100   : > { %v653_v61 = vadd.s32 %v651_v51, %v649_v36  ;;  %v675_v0 = vadd.s32 %v673_v53, %v671_v20  ;;  %vm277_vm3 = vcmp.lt.s32.totalorder %v1911_v26, 0  ;;  %v399_v1 = vsub.s32 4, %v375_v31 }
 0x101   : > { %v665_v46 = vshrl.u32 %v661_v11, 16  ;;  %vm751_vm4 = vcmp.gt.s32.totalorder %v750_v55, 0  ;;  %vm378_vm5 = vcmp.lt.s32.totalorder %v377_v57, 0  ;;  %v379_v41 = vsub.s32 0, %v377_v57 }
 0x102   : > { %v645_v2 = vshrl.u32 %v640_v63, 16  ;;  %v654_v48 = vadd.s32 %v653_v61, %v643_v59  ;;  %v624_v45 = vsel %vm618_vm12, %v621_v33, %v623_v37  ;;  %v667_v39 = vshrl.u32 %v662_v7, 16 }
 0x103   : > { %v676_v4 = vadd.s32 %v675_v0, %v665_v46  ;;  %v752_v6 = vsel %vm751_vm4, %v750_v55, 0  ;;  %v380_v8 = vsel %vm378_vm5, %v379_v41, %v377_v57  ;;  %v2078_v14 = vadd.s32 %v670_v29, %v666_v19 }
 0x104   : > { %v2076_v9 = vadd.s32 %v654_v48, %v645_v2  ;;  %v748_v15 = vor.u32 8388608, %v747_v34  ;;  %v381_v16 = vclz %v380_v8  ;;  %v400_v11 = vsel %vm277_vm3, %v399_v1, %v375_v31 }
 0x105   : > { %v677_v62 = vadd.s32 %v676_v4, %v667_v39  ;;  %v754_v44 = vand.u32 31, %v752_v6  ;;  %vm2084_vm6 = vcmp.le.f32.partialorder %v275_v28, 0.7853982  ;;  %v369_v7 = vadd.s32 %v2026_v43, %v2024_v42 }
 0x106   : > { %v678_v63 = vmul.u32 %v1933_v50, %v624_v45  ;;  %v1474_v17 = vadd.s32 4294967294, %v381_v16  ;;  %vm680_vm7 = vc.u32 %v2076_v9, %v2078_v14  ;;  %v402_v21 = vsel %vm2084_vm6, 0, %v400_v11 }
 0x107   : > { %v681_v18 = vadd.s32 1, %v677_v62  ;;  %v755_v19 = vsub.s32 32, %v754_v44  ;;  %v2095_v22 = vshrl.u32 %v752_v6, 5  ;;  %v757_v28 = vshll.u32 %v1754_v52, %v754_v44 }
 0x108   : > { %v2098_v24 = vshll.u32 %v748_v15, 8  ;;  %vm1475_vm8 = vcmp.lt.s32.totalorder %v1474_v17, 0  ;;  %v760_v50 = vshll.u32 %v1755_v54, %v754_v44  ;;  %v763_v13 = vshll.u32 %v1756_v56, %v754_v44 }
 0x109   : > { %v682_v3 = vsel %vm680_vm7, %v681_v18, %v677_v62  ;;  %v758_v42 = vshrl.u32 %v1755_v54, %v755_v19  ;;  %v384_v43 = vsel %vm1475_vm8, 0, %v1474_v17  ;;  %v761_v29 = vshrl.u32 %v1756_v56, %v755_v19 }
 0x10a   : > { %v683_v25 = vadd.s32 %v682_v3, %v678_v63  ;;  %v385_v31 = vsub.s32 32, %v384_v43  ;;  %v389_v32 = vsub.s32 4294967266, %v384_v43  ;;  %v764_v10 = vshrl.u32 %v1757_v58, %v755_v19  ;;  %v269_v3 = vpop.f32.mrf.mxu3 }
 0x10b   : > { %v766_v49 = vshll.u32 %v1757_v58, %v754_v44  ;;  %v386_v20 = vshll.u32 %v377_v57, %v384_v43  ;;  %v759_v35 = vor.u32 %v758_v42, %v757_v28  ;;  %v767_v33 = vshrl.u32 %v1758_v60, %v755_v19 }
 0x10c   : > { %v684_v34 = vadd.s32 536870912, %v683_v25  ;;  %v387_v36 = vshrl.u32 %v369_v7, %v385_v31  ;;  %v390_v37 = vadd.s32 127, %v389_v32  ;;  %v762_v51 = vor.u32 %v761_v29, %v760_v50 }
 0x10d   : > { %v770_v53 = vshrl.u32 %v1759_v5, %v755_v19  ;;  %v419_v55 = vadd.s32 3, %v402_v21  ;;  %v768_v61 = vor.u32 %v767_v33, %v766_v49  ;;  %v765_v46 = vor.u32 %v764_v10, %v763_v13 }
 0x10e   : > { %v685_v59 = vshrl.u32 %v684_v34, 30  ;;  %v388_v0 = vor.u32 %v387_v36, %v386_v20  ;;  %v391_v1 = vshll.u32 %v390_v37, 23  ;;  %v769_v41 = vshll.u32 %v1758_v60, %v754_v44 }
 0x10f   : > { %vm587_vm9 = vcmp.lt.s32.totalorder %v1914_v27, 0  ;;  %vm772_vm10 = vcmp.lt.s32.totalorder %v2095_v22, 1  ;;  %v789_v2 = vand.u32 65535, %v2098_v24  ;;  %v790_v48 = vshrl.u32 %v2098_v24, 16 }
 0x110   : > { %v686_v57 = vshll.u32 %v685_v59, 30  ;;  %v392_v45 = vor.u32 4788187, %v391_v1  ;;  %v771_v39 = vor.u32 %v770_v53, %v769_v41  ;;  %vm775_vm11 = vcmp.lt.s32.totalorder %v2095_v22, 4 }
 0x111   : > { %v780_v4 = vsel %vm772_vm10, %v759_v35, %v762_v51  ;;  %v2116_v6 = vand.u32 3, %v419_v55  ;;  %vm774_vm12 = vcmp.lt.s32.totalorder %v2095_v22, 3  ;;  %v781_v15 = vsel %vm775_vm11, %v768_v61, 920167782 }
 0x112   : > { %v2118_v8 = vsub.s32 %v683_v25, %v686_v57  ;;  %v393_v16 = vand.u32 2147483647, %v392_v45  ;;  %v395_v11 = vcvt.s32.f32 %v388_v0  ;;  %vm773_vm13 = vcmp.lt.s32.totalorder %v2095_v22, 2 }
 0x113   : > { %v782_v62 = vsel %vm774_vm12, %v765_v46, %v781_v15  ;;  %v756_v7 = vshrl.u32 %v1754_v52, %v755_v19  ;;  %v709_v18 = vsub.s32 4, %v685_v59  ;;  %v784_v21 = vsel %vm772_vm10, %v762_v51, %v765_v46 }
 0x114   : > { %vm688_vm14 = vcmp.lt.s32.totalorder %v2118_v8, 0  ;;  %v689_v44 = vsub.s32 0, %v2118_v8  ;;  %v783_v63 = vsel %vm773_vm13, %v780_v4, %v782_v62  ;;  %v396_v17 = vmul.f32 %v395_v11, %v393_v16 }
 0x115   : > { %v785_v28 = vsel %vm775_vm11, %v771_v39, 1326507024  ;;  %v777_v50 = vsel %vm775_vm11, %v765_v46, 2102212464  ;;  %v813_v43 = vand.u32 65535, %v783_v63  ;;  %v814_v31 = vshrl.u32 %v783_v63, 16 }
 0x116   : > { %v690_v42 = vsel %vm688_vm14, %v689_v44, %v2118_v8  ;;  %v786_v19 = vsel %vm774_vm12, %v768_v61, %v785_v28  ;;  %v397_v25 = vxor.u32 2147483648, %v396_v17  ;;  %v679_v32 = vadd.s32 %v2078_v14, %v2076_v9 }
 0x117   : > { %v691_v29 = vclz %v690_v42  ;;  %v787_v13 = vsel %vm773_vm13, %v784_v21, %v786_v19  ;;  %v2146_v10 = vsel %vm772_vm10, %v756_v7, %v759_v35  ;;  %v2149_v20 = vadd.f32 %v1908_v23, %v269_v3 }
 0x118   : > { %v791_v49 = vand.u32 65535, %v787_v13  ;;  %v398_v34 = vsel %vm277_vm3, %v397_v25, %v396_v17  ;;  %v2155_v36 = vsel %vm587_vm9, %v709_v18, %v685_v59  ;;  %v792_v37 = vshrl.u32 %v787_v13, 16 }
 0x119   : > { %v1480_v33 = vadd.s32 4294967294, %v691_v29  ;;  %v2160_v9 = vsel %vm2084_vm6, %v1911_v26, %v398_v34  ;;  %v2164_v14 = vsel %vm774_vm12, %v762_v51, %v777_v50  ;;  %v815_v53 = vmul.u32 %v813_v43, %v789_v2 }
 0x11a   : > { %v795_v35 = vmul.u32 %v791_v49, %v790_v48  ;;  %v403_v55 = vmul.f32 %v2160_v9, %v2160_v9  ;;  %v794_v61 = vmul.u32 %v792_v37, %v789_v2  ;;  %v2168_v0 = vmul.u32 %v814_v31, %v789_v2 }
 0x11b   : > { %vm1481_vm15 = vcmp.lt.s32.totalorder %v1480_v33, 0  ;;  %v793_v1 = vmul.u32 %v791_v49, %v789_v2  ;;  %v796_v46 = vmul.u32 %v792_v37, %v790_v48  ;;  %v2170_v41 = vmul.u32 %v813_v43, %v790_v48 }
 0x11c   : > { %v694_v59 = vsel %vm1481_vm15, 0, %v1480_v33  ;;  %v404_v40 = vmul.f32 -0.001358992, %v403_v55  ;;  %v411_v57 = vmul.f32 -0.00019511016, %v403_v55  ;;  %v799_v39 = vshll.u32 %v795_v35, 16 }
 0x11d   : > { %v695_v45 = vsub.s32 32, %v694_v59  ;;  %v699_v51 = vsub.s32 4294967266, %v694_v59  ;;  %v797_v4 = vshll.u32 %v794_v61, 16  ;;  %v800_v15 = vshrl.u32 %v795_v35, 16 }
 0x11e   : > { %v818_v16 = vmul.u32 %v814_v31, %v790_v48  ;;  %v405_v11 = vadd.f32 0.041655596, %v404_v40  ;;  %v412_v62 = vadd.f32 0.008332121, %v411_v57  ;;  %v696_v44 = vshll.u32 %v2118_v8, %v694_v59 }
 0x11f   : > { %v697_v7 = vshrl.u32 %v679_v32, %v695_v45  ;;  %v700_v63 = vadd.s32 127, %v699_v51  ;;  %vm801_vm0 = vc.u32 %v793_v1, %v797_v4  ;;  %v803_v17 = vadd.s32 %v797_v4, %v793_v1 }
 0x120   : > { %v819_v2 = vshll.u32 %v2168_v0, 16  ;;  %v406_v18 = vmul.f32 %v405_v11, %v403_v55  ;;  %v413_v21 = vmul.f32 %v412_v62, %v403_v55  ;;  %v802_v3 = vsel %vm801_vm0, 1, %v1760_v12 }
 0x121   : > { %v698_v28 = vor.u32 %v697_v7, %v696_v44  ;;  %vm2177_vm1 = vcmp.le.f32.partialorder %v585_v30, 0.7853982  ;;  %v701_v48 = vshll.u32 %v700_v63, 23  ;;  %v798_v50 = vshrl.u32 %v794_v61, 16 }
 0x122   : > { %v804_v8 = vadd.s32 %v802_v3, %v796_v46  ;;  %vm805_vm2 = vc.u32 %v803_v17, %v799_v39  ;;  %v407_v19 = vadd.f32 -0.4999988, %v406_v18  ;;  %v414_v43 = vadd.f32 -0.16666654, %v413_v21 }
 0x123   : > { %v806_v25 = vsel %vm805_vm2, 1, %v1760_v12  ;;  %v821_v29 = vshll.u32 %v2170_v41, 16  ;;  %vm422_vm3 = vcmp.eq.s32.totalorder %v2116_v6, 0  ;;  %v702_v13 = vor.u32 4788187, %v701_v48 }
 0x124   : > { %v808_v31 = vadd.s32 %v806_v25, %v804_v8  ;;  %vm823_vm4 = vc.u32 %v815_v53, %v819_v2  ;;  %v825_v32 = vadd.s32 %v819_v2, %v815_v53  ;;  %v408_v30 = vmul.f32 %v407_v19, %v403_v55 }
 0x125   : > { %v415_v49 = vmul.f32 %v414_v43, %v403_v55  ;;  %vm421_vm5 = vcmp.lt.s32.totalorder %v2116_v6, 2  ;;  %v705_v34 = vcvt.s32.f32 %v698_v28  ;;  %v824_v33 = vsel %vm823_vm4, 1, %v1760_v12  ;;  %v257_v43 = vpop.f32.mrf.mxu0 }
 0x126   : > { %vm418_vm6 = vweird.f32 %v1911_v26  ;;  %v703_v37 = vand.u32 2147483647, %v702_v13  ;;  %v809_v35 = vadd.s32 %v808_v31, %v798_v50  ;;  %v826_v61 = vadd.s32 %v824_v33, %v818_v16 }
 0x127   : > { %vm827_vm7 = vc.u32 %v825_v32, %v821_v29  ;;  %v409_v59 = vadd.f32 1.0, %v408_v30  ;;  %v416_v1 = vadd.f32 1.0, %v415_v49  ;;  %v820_v46 = vshrl.u32 %v2168_v0, 16 }
 0x128   : > { %v828_v40 = vsel %vm827_vm7, 1, %v1760_v12  ;;  %v706_v53 = vmul.f32 %v705_v34, %v703_v37  ;;  %v810_v57 = vadd.s32 %v809_v35, %v800_v15  ;;  %v1050_v45 = vand.u32 2147483647, %v2149_v20 }
 0x129   : > { %v830_v55 = vadd.s32 %v828_v40, %v826_v61  ;;  %v417_v39 = vmul.f32 %v416_v1, %v2160_v9  ;;  %vm425_vm8 = vcmp.eq.s32.totalorder %v2116_v6, 2  ;;  %v426_v51 = vxor.u32 2147483648, %v409_v59 }
 0x12a   : > { %v1053_v4 = vand.u32 2139095040, %v2149_v20  ;;  %v707_v16 = vxor.u32 2147483648, %v706_v53  ;;  %v822_v11 = vshrl.u32 %v2170_v41, 16  ;;  %v829_v62 = vadd.s32 %v825_v32, %v821_v29 }
 0x12b   : > { %v831_v44 = vadd.s32 %v830_v55, %v820_v46  ;;  %v423_v0 = vxor.u32 2147483648, %v417_v39  ;;  %v712_v15 = vsel %vm2177_vm1, 0, %v2155_v36  ;;  %v779_v9 = vsel %vm773_vm13, %v2146_v10, %v2164_v14 }
 0x12c   : > { %v1054_v7 = vshrl.u32 %v1053_v4, 23  ;;  %v708_v63 = vsel %vm587_vm9, %v707_v16, %v706_v53  ;;  %vm835_vm10 = vc.u32 %v810_v57, %v829_v62  ;;  %v1057_v41 = vand.u32 8388607, %v1050_v45 }
 0x12d   : > { %v832_v17 = vadd.s32 %v831_v44, %v822_v11  ;;  %v424_v2 = vsel %vm422_vm3, %v409_v59, %v423_v0  ;;  %v427_v36 = vsel %vm425_vm8, %v426_v51, %v417_v39  ;;  %v711_v22 = vsel %vm2177_vm1, %v1914_v27, %v708_v63 }
 0x12e   : > { %v1488_v10 = vadd.s32 4294967169, %v1054_v7  ;;  %v428_v14 = vsel %vm421_vm5, %v424_v2, %v427_v36  ;;  %v713_v18 = vmul.f32 %v711_v22, %v711_v22  ;;  %v729_v21 = vadd.s32 3, %v712_v15 }
 0x12f   : > { %v836_v28 = vadd.s32 1, %v832_v17  ;;  %v429_v3 = vsel %vm418_vm6, nan, %v428_v14  ;;  %v833_v48 = vmul.u32 %v2098_v24, %v779_v9  ;;  %v1058_v50 = vor.u32 8388608, %v1057_v41 }
 0x130   : > { %v1060_v8 = vadd.s32 1, %v1488_v10  ;;  %1360 = vst [vmem:[%s2219_s28] sm:$0xff] %v429_v3  ;;  %v714_v42 = vmul.f32 -0.001358992, %v713_v18  ;;  %v721_v19 = vmul.f32 -0.00019511016, %v713_v18  ;;  %v730_v26 = vand.u32 3, %v729_v21 }
 0x131   : > { %v837_v6 = vsel %vm835_vm10, %v836_v28, %v832_v17  ;;  %v2223_v30 = vshll.u32 %v1058_v50, 8  ;;  %v2226_v49 = vadd.f32 %v1908_v23, %v257_v43  ;;  %vm742_vm11 = vcmp.lt.s32.totalorder %v1927_v47, 0 }
 0x132   : > { %v838_v25 = vadd.s32 %v837_v6, %v833_v48  ;;  %vm1061_vm9 = vcmp.gt.s32.totalorder %v1060_v8, 0  ;;  %v715_v29 = vadd.f32 0.041655596, %v714_v42  ;;  %v722_v13 = vadd.f32 0.008332121, %v721_v19 }
 0x133   : > { %v1062_v31 = vsel %vm1061_vm9, %v1060_v8, 0  ;;  %vm2233_vm12 = vcmp.le.f32.partialorder %v740_v38, 0.7853982  ;;  %v2237_v46 = vadd.s32 %v829_v62, %v810_v57  ;;  %v430_v23 = vand.u32 2147483647, %v2226_v49 }
 0x134   : > { %v839_v32 = vadd.s32 536870912, %v838_v25  ;;  %v1064_v24 = vand.u32 31, %v1062_v31  ;;  %v716_v34 = vmul.f32 %v715_v29, %v713_v18  ;;  %v723_v33 = vmul.f32 %v722_v13, %v713_v18 }
 0x135   : > { %vm732_vm13 = vcmp.eq.s32.totalorder %v730_v26, 0  ;;  %vm735_vm14 = vcmp.eq.s32.totalorder %v730_v26, 2  ;;  %v2240_v53 = vshrl.u32 %v1062_v31, 5  ;;  %v2243_v55 = vand.u32 65535, %v2223_v30 }
 0x136   : > { %v840_v37 = vshrl.u32 %v839_v32, 30  ;;  %v2229_v35 = vsub.s32 32, %v1064_v24  ;;  %v717_v61 = vadd.f32 -0.4999988, %v716_v34  ;;  %v724_v59 = vadd.f32 -0.16666654, %v723_v33 }
 0x137   : > { %v433_v39 = vand.u32 2139095040, %v2226_v49  ;;  %vm731_vm15 = vcmp.lt.s32.totalorder %v730_v26, 2  ;;  %v2247_v16 = vshrl.u32 %v2223_v30, 16  ;;  %vm728_vm0 = vweird.f32 %v1914_v27 }
 0x138   : > { %v841_v40 = vshll.u32 %v840_v37, 30  ;;  %v718_v51 = vmul.f32 %v717_v61, %v713_v18  ;;  %v725_v4 = vmul.f32 %v724_v59, %v713_v18  ;;  %v864_v38 = vsub.s32 4, %v840_v37 }
 0x139   : > { %v1067_v11 = vshll.u32 %v1754_v52, %v1064_v24  ;;  %v1068_v62 = vshrl.u32 %v1755_v54, %v2229_v35  ;;  %v1071_v44 = vshrl.u32 %v1756_v56, %v2229_v35  ;;  %v1070_v9 = vshll.u32 %v1755_v54, %v1064_v24 }
 0x13a   : > { %v842_v57 = vsub.s32 %v838_v25, %v841_v40  ;;  %v719_v0 = vadd.f32 1.0, %v718_v51  ;;  %v726_v15 = vadd.f32 1.0, %v725_v4  ;;  %v1077_v7 = vshrl.u32 %v1758_v60, %v2229_v35 }
 0x13b   : > { %v1073_v17 = vshll.u32 %v1756_v56, %v1064_v24  ;;  %v1074_v41 = vshrl.u32 %v1757_v58, %v2229_v35  ;;  %v865_v10 = vsel %vm742_vm11, %v864_v38, %v840_v37  ;;  %v1076_v14 = vshll.u32 %v1757_v58, %v1064_v24 }
 0x13c   : > { %vm843_vm1 = vcmp.lt.s32.totalorder %v842_v57, 0  ;;  %v844_v63 = vsub.s32 0, %v842_v57  ;;  %v727_v2 = vmul.f32 %v726_v15, %v711_v22  ;;  %v736_v36 = vxor.u32 2147483648, %v719_v0 }
 0x13d   : > { %v1069_v21 = vor.u32 %v1068_v62, %v1067_v11  ;;  %v1072_v28 = vor.u32 %v1071_v44, %v1070_v9  ;;  %v1080_v3 = vshrl.u32 %v1759_v5, %v2229_v35  ;;  %v1078_v8 = vor.u32 %v1077_v7, %v1076_v14 }
 0x13e   : > { %v845_v18 = vsel %vm843_vm1, %v844_v63, %v842_v57  ;;  %v733_v48 = vxor.u32 2147483648, %v727_v2  ;;  %v434_v42 = vshrl.u32 %v433_v39, 23  ;;  %v867_v19 = vsel %vm2233_vm12, 0, %v865_v10 }
 0x13f   : > { %v846_v50 = vclz %v845_v18  ;;  %v1075_v22 = vor.u32 %v1074_v41, %v1073_v17  ;;  %v1079_v6 = vshll.u32 %v1758_v60, %v1064_v24  ;;  %v2271_v43 = vand.u32 8388607, %v430_v23 }
 0x140   : > { %v734_v25 = vsel %vm732_vm13, %v719_v0, %v733_v48  ;;  %v737_v29 = vsel %vm735_vm14, %v736_v36, %v727_v2  ;;  %vm1082_vm2 = vcmp.lt.s32.totalorder %v2240_v53, 1  ;;  %vm1085_vm3 = vcmp.lt.s32.totalorder %v2240_v53, 4 }
 0x141   : > { %v1483_v13 = vadd.s32 4294967294, %v846_v50  ;;  %v738_v31 = vsel %vm731_vm15, %v734_v25, %v737_v29  ;;  %v1081_v32 = vor.u32 %v1080_v3, %v1079_v6  ;;  %v1090_v34 = vsel %vm1082_vm2, %v1069_v21, %v1072_v28 }
 0x142   : > { %v739_v24 = vsel %vm728_vm0, nan, %v738_v31  ;;  %vm1084_vm5 = vcmp.lt.s32.totalorder %v2240_v53, 3  ;;  %v1091_v33 = vsel %vm1085_vm3, %v1078_v8, 920167782  ;;  %v884_v61 = vadd.s32 3, %v867_v19 }
 0x143   : > { %vm1484_vm4 = vcmp.lt.s32.totalorder %v1483_v13, 0  ;;  %1362 = vst [vmem:[%s2219_s28 + $0x10] sm:$0xff] %v739_v24  ;;  %vm1083_vm6 = vcmp.lt.s32.totalorder %v2240_v53, 2  ;;  %v1092_v26 = vsel %vm1084_vm5, %v1075_v22, %v1091_v33  ;;  %v1094_v39 = vsel %vm1082_vm2, %v1072_v28, %v1075_v22 }
 0x144   : > { %v849_v37 = vsel %vm1484_vm4, 0, %v1483_v13  ;;  %v1093_v27 = vsel %vm1083_vm6, %v1090_v34, %v1092_v26  ;;  %v1066_v51 = vshrl.u32 %v1754_v52, %v2229_v35  ;;  %v1095_v4 = vsel %vm1085_vm3, %v1081_v32, 1326507024 }
 0x145   : > { %v850_v59 = vsub.s32 32, %v849_v37  ;;  %v854_v40 = vsub.s32 4294967266, %v849_v37  ;;  %v1123_v38 = vand.u32 65535, %v1093_v27  ;;  %v1124_v11 = vshrl.u32 %v1093_v27, 16 }
 0x146   : > { %v851_v62 = vshll.u32 %v842_v57, %v849_v37  ;;  %v1096_v15 = vsel %vm1084_vm5, %v1078_v8, %v1095_v4  ;;  %v2300_v9 = vand.u32 3, %v884_v61  ;;  %v1087_v7 = vsel %vm1085_vm3, %v1075_v22, 2102212464 }
 0x147   : > { %v852_v44 = vshrl.u32 %v2237_v46, %v850_v59  ;;  %v855_v0 = vadd.s32 127, %v854_v40  ;;  %v1097_v35 = vsel %vm1083_vm6, %v1094_v39, %v1096_v15  ;;  %v1126_v63 = vmul.u32 %v1124_v11, %v2243_v55 }
 0x148   : > { %v1101_v2 = vand.u32 65535, %v1097_v35  ;;  %v1102_v57 = vshrl.u32 %v1097_v35, 16  ;;  %v1086_v46 = vsel %vm1082_vm2, %v1066_v51, %v1069_v21  ;;  %v1125_v36 = vmul.u32 %v1123_v38, %v2243_v55 }
 0x149   : > { %v853_v17 = vor.u32 %v852_v44, %v851_v62  ;;  %v856_v41 = vshll.u32 %v855_v0, 23  ;;  %v1127_v10 = vmul.u32 %v1123_v38, %v2247_v16  ;;  %v1129_v14 = vshll.u32 %v1126_v63, 16 }
 0x14a   : > { %v1088_v3 = vsel %vm1084_vm5, %v1072_v28, %v1087_v7  ;;  %v1104_v48 = vmul.u32 %v1102_v57, %v2243_v55  ;;  %v1476_v50 = vadd.s32 4294967169, %v434_v42  ;;  %v1105_v19 = vmul.u32 %v1101_v2, %v2247_v16 }
 0x14b   : > { %v857_v18 = vor.u32 4788187, %v856_v41  ;;  %v860_v8 = vcvt.s32.f32 %v853_v17  ;;  %v1128_v22 = vmul.u32 %v1124_v11, %v2247_v16  ;;  %vm1133_vm7 = vc.u32 %v1125_v36, %v1129_v14 }
 0x14c   : > { %v1103_v21 = vmul.u32 %v1101_v2, %v2243_v55  ;;  %v1107_v25 = vshll.u32 %v1104_v48, 16  ;;  %v1134_v29 = vsel %vm1133_vm7, 1, %v1760_v12  ;;  %v1106_v13 = vmul.u32 %v1102_v57, %v2247_v16 }
 0x14d   : > { %v858_v6 = vand.u32 2147483647, %v857_v18  ;;  %v1131_v31 = vshll.u32 %v1127_v10, 16  ;;  %v1135_v32 = vadd.s32 %v1129_v14, %v1125_v36  ;;  %v1136_v28 = vadd.s32 %v1134_v29, %v1128_v22 }
 0x14e   : > { %v1109_v24 = vshll.u32 %v1105_v19, 16  ;;  %vm1111_vm8 = vc.u32 %v1103_v21, %v1107_v25  ;;  %v1113_v42 = vadd.s32 %v1107_v25, %v1103_v21  ;;  %v1089_v33 = vsel %vm1083_vm6, %v1086_v46, %v1088_v3 }
 0x14f   : > { %v861_v34 = vmul.f32 %v860_v8, %v858_v6  ;;  %v1112_v37 = vsel %vm1111_vm8, 1, %v1760_v12  ;;  %vm1137_vm10 = vc.u32 %v1135_v32, %v1131_v31  ;;  %v440_v61 = vadd.s32 1, %v1476_v50 }
 0x150   : > { %v1114_v26 = vadd.s32 %v1112_v37, %v1106_v13  ;;  %vm1115_vm9 = vc.u32 %v1113_v42, %v1109_v24  ;;  %v1138_v59 = vsel %vm1137_vm10, 1, %v1760_v12  ;;  %v1130_v40 = vshrl.u32 %v1126_v63, 16 }
 0x151   : > { %v862_v55 = vxor.u32 2147483648, %v861_v34  ;;  %v1116_v16 = vsel %vm1115_vm9, 1, %v1760_v12  ;;  %v1140_v27 = vadd.s32 %v1138_v59, %v1136_v28  ;;  %vm441_vm13 = vcmp.gt.s32.totalorder %v440_v61, 0 }
 0x152   : > { %v1108_v51 = vshrl.u32 %v1104_v48, 16  ;;  %v1118_v53 = vadd.s32 %v1116_v16, %v1114_v26  ;;  %v442_v4 = vsel %vm441_vm13, %v440_v61, 0  ;;  %v1132_v11 = vshrl.u32 %v1127_v10, 16 }
 0x153   : > { %v863_v39 = vsel %vm742_vm11, %v862_v55, %v861_v34  ;;  %v1141_v62 = vadd.s32 %v1140_v27, %v1130_v40  ;;  %v444_v44 = vand.u32 31, %v442_v4  ;;  %v1110_v15 = vshrl.u32 %v1105_v19, 16 }
 0x154   : > { %v866_v38 = vsel %vm2233_vm12, %v1927_v47, %v863_v39  ;;  %v1119_v7 = vadd.s32 %v1118_v53, %v1108_v51  ;;  %v1143_v35 = vmul.u32 %v2223_v30, %v1089_v33  ;;  %v438_v17 = vor.u32 8388608, %v2271_v43 }
 0x155   : > { %v868_v0 = vmul.f32 %v866_v38, %v866_v38  ;;  %v1142_v63 = vadd.s32 %v1141_v62, %v1132_v11  ;;  %v2331_v41 = vsub.s32 32, %v444_v44  ;;  %v447_v2 = vshll.u32 %v1754_v52, %v444_v44 }
 0x156   : > { %v2334_v36 = vadd.s32 %v1119_v7, %v1110_v15  ;;  %v2336_v1 = vadd.s32 %v1135_v32, %v1131_v31  ;;  %v450_v18 = vshll.u32 %v1755_v54, %v444_v44  ;;  %v453_v48 = vshll.u32 %v1756_v56, %v444_v44 }
 0x157   : > { %v869_v57 = vmul.f32 -0.001358992, %v868_v0  ;;  %v876_v46 = vmul.f32 -0.00019511016, %v868_v0  ;;  %v1146_v10 = vadd.s32 1, %v1142_v63  ;;  %v448_v14 = vshrl.u32 %v1755_v54, %v2331_v41 }
 0x158   : > { %v451_v30 = vshrl.u32 %v1756_v56, %v2331_v41  ;;  %vm1145_vm11 = vc.u32 %v2334_v36, %v2336_v1  ;;  %v2346_v8 = vshrl.u32 %v442_v4, 5  ;;  %v454_v22 = vshrl.u32 %v1757_v58, %v2331_v41 }
 0x159   : > { %v870_v43 = vadd.f32 0.041655596, %v869_v57  ;;  %v877_v3 = vadd.f32 0.008332121, %v876_v46  ;;  %v1147_v50 = vsel %vm1145_vm11, %v1146_v10, %v1142_v63  ;;  %v2348_v19 = vor.u32 %v448_v14, %v447_v2 }
 0x15a   : > { %v1148_v25 = vadd.s32 %v1147_v50, %v1143_v35  ;;  %v456_v29 = vshll.u32 %v1757_v58, %v444_v44  ;;  %v2353_v13 = vor.u32 %v451_v30, %v450_v18  ;;  %v457_v31 = vshrl.u32 %v1758_v60, %v2331_v41 }
 0x15b   : > { %v871_v6 = vmul.f32 %v870_v43, %v868_v0  ;;  %v878_v21 = vmul.f32 %v877_v3, %v868_v0  ;;  %v459_v32 = vshll.u32 %v1758_v60, %v444_v44  ;;  %v460_v28 = vshrl.u32 %v1759_v5, %v2331_v41 }
 0x15c   : > { %v1149_v42 = vadd.s32 536870912, %v1148_v25  ;;  %v455_v33 = vor.u32 %v454_v22, %v453_v48  ;;  %v458_v37 = vor.u32 %v457_v31, %v456_v29  ;;  %vm462_vm12 = vcmp.lt.s32.totalorder %v2346_v8, 1 }
 0x15d   : > { %v872_v34 = vadd.f32 -0.4999988, %v871_v6  ;;  %v879_v24 = vadd.f32 -0.16666654, %v878_v21  ;;  %v461_v61 = vor.u32 %v460_v28, %v459_v32  ;;  %vm464_vm14 = vcmp.lt.s32.totalorder %v2346_v8, 3 }
 0x15e   : > { %v2362_v59 = vshrl.u32 %v1149_v42, 30  ;;  %vm465_vm15 = vcmp.lt.s32.totalorder %v2346_v8, 4  ;;  %vm886_vm0 = vcmp.lt.s32.totalorder %v2300_v9, 2  ;;  %v2368_v40 = vshll.u32 %v438_v17, 8 }
 0x15f   : > { %v873_v55 = vmul.f32 %v872_v34, %v868_v0  ;;  %v880_v26 = vmul.f32 %v879_v24, %v868_v0  ;;  %v471_v16 = vsel %vm465_vm15, %v458_v37, 920167782  ;;  %v470_v53 = vsel %vm462_vm12, %v2348_v19, %v2353_v13 }
 0x160   : > { %v1151_v51 = vshll.u32 %v2362_v59, 30  ;;  %vm887_vm1 = vcmp.eq.s32.totalorder %v2300_v9, 0  ;;  %vm463_vm2 = vcmp.lt.s32.totalorder %v2346_v8, 2  ;;  %v472_v4 = vsel %vm464_vm14, %v455_v33, %v471_v16 }
 0x161   : > { %v874_v27 = vadd.f32 1.0, %v873_v55  ;;  %v881_v39 = vadd.f32 1.0, %v880_v26  ;;  %v475_v11 = vsel %vm465_vm15, %v461_v61, 1326507024  ;;  %v474_v15 = vsel %vm462_vm12, %v2353_v13, %v455_v33 }
 0x162   : > { %v1152_v0 = vsub.s32 %v1148_v25, %v1151_v51  ;;  %vm890_vm3 = vcmp.eq.s32.totalorder %v2300_v9, 2  ;;  %v473_v7 = vsel %vm463_vm2, %v470_v53, %v472_v4  ;;  %v476_v35 = vsel %vm464_vm14, %v458_v37, %v475_v11 }
 0x163   : > { %v882_v62 = vmul.f32 %v881_v39, %v866_v38  ;;  %v891_v44 = vxor.u32 2147483648, %v874_v27  ;;  %v479_v63 = vand.u32 65535, %v2368_v40  ;;  %v480_v38 = vshrl.u32 %v2368_v40, 16 }
 0x164   : > { %vm1153_vm4 = vcmp.lt.s32.totalorder %v1152_v0, 0  ;;  %v1154_v2 = vsub.s32 0, %v1152_v0  ;;  %v446_v46 = vshrl.u32 %v1754_v52, %v2331_v41  ;;  %v477_v10 = vsel %vm463_vm2, %v474_v15, %v476_v35  ;;  %v266_v15 = vpop.f32.mrf.mxu2 }
 0x165   : > { %v888_v17 = vxor.u32 2147483648, %v882_v62  ;;  %v892_v57 = vsel %vm890_vm3, %v891_v44, %v882_v62  ;;  %v503_v14 = vand.u32 65535, %v473_v7  ;;  %v481_v43 = vand.u32 65535, %v477_v10 }
 0x166   : > { %v1155_v30 = vsel %vm1153_vm4, %v1154_v2, %v1152_v0  ;;  %v482_v3 = vshrl.u32 %v477_v10, 16  ;;  %vm883_vm5 = vweird.f32 %v1927_v47  ;;  %v504_v22 = vshrl.u32 %v473_v7, 16  ;;  %v272_v2 = vpop.f32.mrf.mxu3 }
 0x167   : > { %v889_v18 = vsel %vm887_vm1, %v874_v27, %v888_v17  ;;  %v1156_v50 = vclz %v1155_v30  ;;  %v485_v41 = vmul.u32 %v481_v43, %v480_v38  ;;  %v1144_v25 = vadd.s32 %v2336_v1, %v2334_v36 }
 0x168   : > { %v893_v48 = vsel %vm886_vm0, %v889_v18, %v892_v57  ;;  %v484_v21 = vmul.u32 %v482_v3, %v479_v63  ;;  %v466_v31 = vsel %vm462_vm12, %v446_v46, %v2348_v19  ;;  %v467_v47 = vsel %vm465_vm15, %v455_v33, 2102212464  ;;  %v1618_v18 = vld [vmem:[%s2707_s2] ss:$0 sm:$0xff] }
 0x169   : > { %v894_v6 = vsel %vm883_vm5, nan, %v893_v48  ;;  %v1489_v29 = vadd.s32 4294967294, %v1156_v50  ;;  %v483_v32 = vmul.u32 %v481_v43, %v479_v63  ;;  %v505_v28 = vmul.u32 %v503_v14, %v479_v63 }
 0x16a   : > { %1363 = vst [vmem:[%s2219_s28 + $0x18] sm:$0xff] %v894_v6  ;;  %v487_v9 = vshll.u32 %v484_v21, 16  ;;  %v486_v34 = vmul.u32 %v482_v3, %v480_v38  ;;  %v489_v24 = vshll.u32 %v485_v41, 16  ;;  %v506_v42 = vmul.u32 %v504_v22, %v479_v63 }
 0x16b   : > { %vm1490_vm6 = vcmp.lt.s32.totalorder %v1489_v29, 0  ;;  %v507_v55 = vmul.u32 %v503_v14, %v480_v38  ;;  %vm1052_vm8 = vcmp.lt.s32.totalorder %v2149_v20, 0  ;;  %v488_v26 = vshrl.u32 %v484_v21, 16 }
 0x16c   : > { %v1159_v37 = vsel %vm1490_vm6, 0, %v1489_v29  ;;  %vm491_vm7 = vc.u32 %v483_v32, %v487_v9  ;;  %v493_v61 = vadd.s32 %v487_v9, %v483_v32  ;;  %v508_v33 = vmul.u32 %v504_v22, %v480_v38 }
 0x16d   : > { %v1160_v36 = vsub.s32 32, %v1159_v37  ;;  %v1164_v1 = vsub.s32 4294967266, %v1159_v37  ;;  %v492_v19 = vsel %vm491_vm7, 1, %v1760_v12  ;;  %v509_v27 = vshll.u32 %v506_v42, 16 }
 0x16e   : > { %v494_v16 = vadd.s32 %v492_v19, %v486_v34  ;;  %vm495_vm10 = vc.u32 %v493_v61, %v489_v24  ;;  %v1161_v39 = vshll.u32 %v1152_v0, %v1159_v37  ;;  %v511_v62 = vshll.u32 %v507_v55, 16 }
 0x16f   : > { %v1162_v51 = vshrl.u32 %v1144_v25, %v1160_v36  ;;  %v1165_v53 = vadd.s32 127, %v1164_v1  ;;  %v496_v4 = vsel %vm495_vm10, 1, %v1760_v12  ;;  %vm513_vm9 = vc.u32 %v505_v28, %v509_v27 }
 0x170   : > { %v498_v11 = vadd.s32 %v496_v4, %v494_v16  ;;  %v515_v44 = vadd.s32 %v509_v27, %v505_v28  ;;  %v1174_v63 = vsub.s32 4, %v2362_v59  ;;  %v514_v17 = vsel %vm513_vm9, 1, %v1760_v12 }
 0x171   : > { %v1163_v7 = vor.u32 %v1162_v51, %v1161_v39  ;;  %v1166_v35 = vshll.u32 %v1165_v53, 23  ;;  %v468_v0 = vsel %vm464_vm14, %v2353_v13, %v467_v47  ;;  %v516_v57 = vadd.s32 %v514_v17, %v508_v33 }
 0x172   : > { %v499_v38 = vadd.s32 %v498_v11, %v488_v26  ;;  %vm517_vm13 = vc.u32 %v515_v44, %v511_v62  ;;  %v490_v10 = vshrl.u32 %v485_v41, 16  ;;  %v2420_v30 = vadd.f32 %v1618_v18, %v266_v15 }
 0x173   : > { %v1167_v46 = vor.u32 4788187, %v1166_v35  ;;  %v518_v14 = vsel %vm517_vm13, 1, %v1760_v12  ;;  %v1170_v43 = vcvt.s32.f32 %v1163_v7  ;;  %v510_v3 = vshrl.u32 %v506_v42, 16 }
 0x174   : > { %v520_v48 = vadd.s32 %v518_v14, %v516_v57  ;;  %v2422_v50 = vadd.f32 %v1618_v18, %v272_v2  ;;  %v500_v13 = vadd.s32 %v499_v38, %v490_v10  ;;  %v895_v6 = vand.u32 2147483647, %v2420_v30 }
 0x175   : > { %v1168_v22 = vand.u32 2147483647, %v1167_v46  ;;  %v898_v21 = vand.u32 2139095040, %v2420_v30  ;;  %v1175_v41 = vsel %vm1052_vm8, %v1174_v63, %v2362_v59  ;;  %v512_v25 = vshrl.u32 %v507_v55, 16 }
 0x176   : > { %v521_v29 = vadd.s32 %v520_v48, %v510_v3  ;;  %v519_v32 = vadd.s32 %v515_v44, %v511_v62  ;;  %v902_v28 = vand.u32 8388607, %v895_v6  ;;  %vm1051_vm11 = vcmp.le.f32.partialorder %v1050_v45, 0.7853982 }
 0x177   : > { %v1171_v47 = vmul.f32 %v1170_v43, %v1168_v22  ;;  %v899_v9 = vshrl.u32 %v898_v21, 23  ;;  %v469_v34 = vsel %vm463_vm2, %v466_v31, %v468_v0  ;;  %v1208_v42 = vand.u32 2139095040, %v2422_v50 }
 0x178   : > { %v522_v24 = vadd.s32 %v521_v29, %v512_v25  ;;  %v1177_v61 = vsel %vm1051_vm11, 0, %v1175_v41  ;;  %vm525_vm12 = vc.u32 %v500_v13, %v519_v32  ;;  %v903_v36 = vor.u32 8388608, %v902_v28 }
 0x179   : > { %v1172_v37 = vxor.u32 2147483648, %v1171_v47  ;;  %v1485_v59 = vadd.s32 4294967169, %v899_v9  ;;  %v523_v26 = vmul.u32 %v2368_v40, %v469_v34  ;;  %v1194_v16 = vadd.s32 3, %v1177_v61 }
 0x17a   : > { %v526_v55 = vadd.s32 1, %v522_v24  ;;  %v1209_v31 = vshrl.u32 %v1208_v42, 23  ;;  %v2440_v51 = vshll.u32 %v903_v36, 8  ;;  %v2444_v63 = vadd.s32 %v519_v32, %v500_v13 }
 0x17b   : > { %v1173_v1 = vsel %vm1052_vm8, %v1172_v37, %v1171_v47  ;;  %v905_v19 = vadd.s32 1, %v1485_v59  ;;  %v2442_v62 = vand.u32 3, %v1194_v16  ;;  %v1205_v0 = vand.u32 2147483647, %v2422_v50 }
 0x17c   : > { %v1176_v45 = vsel %vm1051_vm11, %v2149_v20, %v1173_v1  ;;  %v527_v8 = vsel %vm525_vm12, %v526_v55, %v522_v24  ;;  %v1491_v15 = vadd.s32 4294967169, %v1209_v31  ;;  %v2447_v2 = vand.u32 65535, %v2440_v51 }
 0x17d   : > { %v1178_v33 = vmul.f32 %v1176_v45, %v1176_v45  ;;  %v528_v27 = vadd.s32 %v527_v8, %v523_v26  ;;  %vm906_vm14 = vcmp.gt.s32.totalorder %v905_v19, 0  ;;  %vm432_vm15 = vcmp.lt.s32.totalorder %v2226_v49, 0 }
 0x17e   : > { %v907_v39 = vsel %vm906_vm14, %v905_v19, 0  ;;  %v2452_v10 = vshrl.u32 %v2440_v51, 16  ;;  %vm1200_vm0 = vcmp.eq.s32.totalorder %v2442_v62, 2  ;;  %v2459_v3 = vadd.s32 1, %v1491_v15 }
 0x17f   : > { %v1179_v53 = vmul.f32 -0.001358992, %v1178_v33  ;;  %v1186_v4 = vmul.f32 -0.00019511016, %v1178_v33  ;;  %v529_v11 = vadd.s32 536870912, %v528_v27  ;;  %v909_v44 = vand.u32 31, %v907_v39 }
 0x180   : > { %v2455_v14 = vshrl.u32 %v907_v39, 5  ;;  %vm1197_vm1 = vcmp.eq.s32.totalorder %v2442_v62, 0  ;;  %vm1196_vm2 = vcmp.lt.s32.totalorder %v2442_v62, 2  ;;  %vm1193_vm4 = vweird.f32 %v2149_v20 }
 0x181   : > { %v1180_v40 = vadd.f32 0.041655596, %v1179_v53  ;;  %v1187_v7 = vadd.f32 0.008332121, %v1186_v4  ;;  %v530_v35 = vshrl.u32 %v529_v11, 30  ;;  %v910_v17 = vsub.s32 32, %v909_v44 }
 0x182   : > { %v912_v21 = vshll.u32 %v1754_v52, %v909_v44  ;;  %v915_v25 = vshll.u32 %v1755_v54, %v909_v44  ;;  %v918_v29 = vshll.u32 %v1756_v56, %v909_v44  ;;  %v921_v42 = vshll.u32 %v1757_v58, %v909_v44 }
 0x183   : > { %v1181_v38 = vmul.f32 %v1180_v40, %v1178_v33  ;;  %v1188_v57 = vmul.f32 %v1187_v7, %v1178_v33  ;;  %v531_v46 = vshll.u32 %v530_v35, 30  ;;  %v913_v18 = vshrl.u32 %v1755_v54, %v910_v17 }
 0x184   : > { %v916_v43 = vshrl.u32 %v1756_v56, %v910_v17  ;;  %v554_v41 = vsub.s32 4, %v530_v35  ;;  %v919_v47 = vshrl.u32 %v1757_v58, %v910_v17  ;;  %v922_v37 = vshrl.u32 %v1758_v60, %v910_v17 }
 0x185   : > { %v1182_v48 = vadd.f32 -0.4999988, %v1181_v38  ;;  %v1189_v22 = vadd.f32 -0.16666654, %v1188_v57  ;;  %v2461_v13 = vsub.s32 %v528_v27, %v531_v46  ;;  %v914_v34 = vor.u32 %v913_v18, %v912_v21 }
 0x186   : > { %v917_v24 = vor.u32 %v916_v43, %v915_v25  ;;  %v925_v36 = vshrl.u32 %v1759_v5, %v910_v17  ;;  %vm2478_vm5 = vcmp.le.f32.partialorder %v430_v23, 0.7853982  ;;  %v920_v19 = vor.u32 %v919_v47, %v918_v29 }
 0x187   : > { %v1183_v32 = vmul.f32 %v1182_v48, %v1178_v33  ;;  %v1190_v9 = vmul.f32 %v1189_v22, %v1178_v33  ;;  %vm533_vm3 = vcmp.lt.s32.totalorder %v2461_v13, 0  ;;  %v534_v28 = vsub.s32 0, %v2461_v13 }
 0x188   : > { %v923_v16 = vor.u32 %v922_v37, %v921_v42  ;;  %v924_v8 = vshll.u32 %v1758_v60, %v909_v44  ;;  %v911_v27 = vshrl.u32 %v1754_v52, %v910_v17  ;;  %vm927_vm6 = vcmp.lt.s32.totalorder %v2455_v14, 1 }
 0x189   : > { %v1184_v61 = vadd.f32 1.0, %v1183_v32  ;;  %v1191_v59 = vadd.f32 1.0, %v1190_v9  ;;  %v535_v55 = vsel %vm533_vm3, %v534_v28, %v2461_v13  ;;  %v555_v53 = vsel %vm432_vm15, %v554_v41, %v530_v35 }
 0x18a   : > { %v536_v26 = vclz %v535_v55  ;;  %v926_v4 = vor.u32 %v925_v36, %v924_v8  ;;  %vm928_vm7 = vcmp.lt.s32.totalorder %v2455_v14, 2  ;;  %vm929_vm8 = vcmp.lt.s32.totalorder %v2455_v14, 3 }
 0x18b   : > { %v1192_v31 = vmul.f32 %v1191_v59, %v1176_v45  ;;  %v1201_v33 = vxor.u32 2147483648, %v1184_v61  ;;  %vm930_vm10 = vcmp.lt.s32.totalorder %v2455_v14, 4  ;;  %v935_v44 = vsel %vm927_vm6, %v914_v34, %v917_v24 }
 0x18c   : > { %v1477_v39 = vadd.s32 4294967294, %v536_v26  ;;  %v932_v45 = vsel %vm930_vm10, %v920_v19, 2102212464  ;;  %v936_v15 = vsel %vm930_vm10, %v923_v16, 920167782  ;;  %v931_v35 = vsel %vm927_vm6, %v911_v27, %v914_v34 }
 0x18d   : > { %v1198_v23 = vxor.u32 2147483648, %v1192_v31  ;;  %v1202_v11 = vsel %vm1200_vm0, %v1201_v33, %v1192_v31  ;;  %v937_v17 = vsel %vm929_vm8, %v920_v19, %v936_v15  ;;  %v933_v18 = vsel %vm929_vm8, %v917_v24, %v932_v45 }
 0x18e   : > { %vm1478_vm9 = vcmp.lt.s32.totalorder %v1477_v39, 0  ;;  %v938_v22 = vsel %vm928_vm7, %v935_v44, %v937_v17  ;;  %v939_v21 = vsel %vm927_vm6, %v917_v24, %v920_v19  ;;  %v940_v25 = vsel %vm930_vm10, %v926_v4, 1326507024 }
 0x18f   : > { %v1199_v40 = vsel %vm1197_vm1, %v1184_v61, %v1198_v23  ;;  %v539_v7 = vsel %vm1478_vm9, 0, %v1477_v39  ;;  %v968_v29 = vand.u32 65535, %v938_v22  ;;  %v557_v20 = vsel %vm2478_vm5, 0, %v555_v53 }
 0x190   : > { %v1203_v38 = vsel %vm1196_vm2, %v1199_v40, %v1202_v11  ;;  %v540_v57 = vsub.s32 32, %v539_v7  ;;  %v544_v46 = vsub.s32 4294967266, %v539_v7  ;;  %v541_v48 = vshll.u32 %v2461_v13, %v539_v7 }
 0x191   : > { %v1204_v43 = vsel %vm1193_vm4, nan, %v1203_v38  ;;  %v2523_v13 = vsel %vm928_vm7, %v931_v35, %v933_v18  ;;  %v941_v47 = vsel %vm929_vm8, %v923_v16, %v940_v25  ;;  %v969_v32 = vshrl.u32 %v938_v22, 16 }
 0x192   : > { %1365 = vst [vmem:[%s2219_s28 + $0x28] sm:$0xff] %v1204_v43  ;;  %v542_v62 = vshrl.u32 %v2444_v63, %v540_v57  ;;  %v545_v41 = vadd.s32 127, %v544_v46  ;;  %v942_v63 = vsel %vm928_vm7, %v939_v21, %v941_v47  ;;  %vm1216_vm13 = vcmp.gt.s32.totalorder %v2459_v3, 0 }
 0x193   : > { %v946_v34 = vand.u32 65535, %v942_v63  ;;  %v947_v24 = vshrl.u32 %v942_v63, 16  ;;  %v971_v42 = vmul.u32 %v969_v32, %v2447_v2  ;;  %v972_v37 = vmul.u32 %v968_v29, %v2452_v10 }
 0x194   : > { %v543_v9 = vor.u32 %v542_v62, %v541_v48  ;;  %v546_v28 = vshll.u32 %v545_v41, 23  ;;  %v2532_v59 = vadd.s32 3, %v557_v20  ;;  %v988_v55 = vmul.u32 %v2440_v51, %v2523_v13 }
 0x195   : > { %v2538_v36 = vand.u32 8388607, %v1205_v0  ;;  %v949_v14 = vmul.u32 %v947_v24, %v2447_v2  ;;  %v950_v26 = vmul.u32 %v946_v34, %v2452_v10  ;;  %v970_v19 = vmul.u32 %v968_v29, %v2447_v2 }
 0x196   : > { %v547_v61 = vor.u32 4788187, %v546_v28  ;;  %v1217_v16 = vsel %vm1216_vm13, %v2459_v3, 0  ;;  %v550_v31 = vcvt.s32.f32 %v543_v9  ;;  %v973_v33 = vmul.u32 %v969_v32, %v2452_v10 }
 0x197   : > { %v974_v27 = vshll.u32 %v971_v42, 16  ;;  %v948_v39 = vmul.u32 %v946_v34, %v2447_v2  ;;  %v951_v53 = vmul.u32 %v947_v24, %v2452_v10  ;;  %v952_v4 = vshll.u32 %v949_v14, 16 }
 0x198   : > { %v548_v8 = vand.u32 2147483647, %v547_v61  ;;  %v976_v23 = vshll.u32 %v972_v37, 16  ;;  %v954_v45 = vshll.u32 %v950_v26, 16  ;;  %v1219_v3 = vand.u32 31, %v1217_v16 }
 0x199   : > { %vm978_vm11 = vc.u32 %v970_v19, %v974_v27  ;;  %v980_v44 = vadd.s32 %v974_v27, %v970_v19  ;;  %vm956_vm12 = vc.u32 %v948_v39, %v952_v4  ;;  %v958_v15 = vadd.s32 %v952_v4, %v948_v39 }
 0x19a   : > { %v551_v11 = vmul.f32 %v550_v31, %v548_v8  ;;  %v979_v40 = vsel %vm978_vm11, 1, %v1760_v12  ;;  %v957_v35 = vsel %vm956_vm12, 1, %v1760_v12  ;;  %v975_v2 = vshrl.u32 %v971_v42, 16 }
 0x19b   : > { %v981_v17 = vadd.s32 %v979_v40, %v973_v33  ;;  %vm982_vm14 = vc.u32 %v980_v44, %v976_v23  ;;  %v959_v38 = vadd.s32 %v957_v35, %v951_v53  ;;  %vm960_vm0 = vc.u32 %v958_v15, %v954_v45 }
 0x19c   : > { %v552_v7 = vxor.u32 2147483648, %v551_v11  ;;  %v983_v10 = vsel %vm982_vm14, 1, %v1760_v12  ;;  %v961_v46 = vsel %vm960_vm0, 1, %v1760_v12  ;;  %v2553_v43 = vsub.s32 32, %v1219_v3 }
 0x19d   : > { %v985_v18 = vadd.s32 %v983_v10, %v981_v17  ;;  %v953_v22 = vshrl.u32 %v949_v14, 16  ;;  %v963_v21 = vadd.s32 %v961_v46, %v959_v38  ;;  %v2558_v62 = vshrl.u32 %v1217_v16, 5 }
 0x19e   : > { %v553_v57 = vsel %vm432_vm15, %v552_v7, %v551_v11  ;;  %v955_v25 = vshrl.u32 %v950_v26, 16  ;;  %v977_v29 = vshrl.u32 %v972_v37, 16  ;;  %v2560_v32 = vadd.s32 %v980_v44, %v976_v23 }
 0x19f   : > { %v556_v48 = vsel %vm2478_vm5, %v2226_v49, %v553_v57  ;;  %v986_v20 = vadd.s32 %v985_v18, %v975_v2  ;;  %v964_v47 = vadd.s32 %v963_v21, %v953_v22  ;;  %v1222_v9 = vshll.u32 %v1754_v52, %v1219_v3 }
 0x1a0   : > { %v558_v41 = vmul.f32 %v556_v48, %v556_v48  ;;  %v1225_v28 = vshll.u32 %v1755_v54, %v1219_v3  ;;  %v1223_v1 = vshrl.u32 %v1755_v54, %v2553_v43  ;;  %v1226_v61 = vshrl.u32 %v1756_v56, %v2553_v43 }
 0x1a1   : > { %v987_v24 = vadd.s32 %v986_v20, %v977_v29  ;;  %v2566_v42 = vadd.s32 %v964_v47, %v955_v25  ;;  %v1229_v37 = vshrl.u32 %v1757_v58, %v2553_v43  ;;  %v1231_v14 = vshll.u32 %v1757_v58, %v1219_v3 }
 0x1a2   : > { %v559_v63 = vmul.f32 -0.001358992, %v558_v41  ;;  %v566_v34 = vmul.f32 -0.00019511016, %v558_v41  ;;  %v1232_v8 = vshrl.u32 %v1758_v60, %v2553_v43  ;;  %v1228_v54 = vshll.u32 %v1756_v56, %v1219_v3 }
 0x1a3   : > { %v991_v16 = vadd.s32 1, %v987_v24  ;;  %vm990_vm15 = vc.u32 %v2566_v42, %v2560_v32  ;;  %v1234_v31 = vshll.u32 %v1758_v60, %v1219_v3  ;;  %v1235_v33 = vshrl.u32 %v1759_v5, %v2553_v43 }
 0x1a4   : > { %v560_v26 = vadd.f32 0.041655596, %v559_v63  ;;  %v567_v19 = vadd.f32 0.008332121, %v566_v34  ;;  %v1233_v58 = vor.u32 %v1232_v8, %v1231_v14  ;;  %v2584_v23 = vor.u32 %v1223_v1, %v1222_v9 }
 0x1a5   : > { %v992_v53 = vsel %vm990_vm15, %v991_v16, %v987_v24  ;;  %v2586_v11 = vor.u32 %v1226_v61, %v1225_v28  ;;  %v2588_v45 = vor.u32 %v1229_v37, %v1228_v54  ;;  %v1236_v60 = vor.u32 %v1235_v33, %v1234_v31 }
 0x1a6   : > { %v561_v27 = vmul.f32 %v560_v26, %v558_v41  ;;  %v568_v39 = vmul.f32 %v567_v19, %v558_v41  ;;  %v993_v4 = vadd.s32 %v992_v53, %v988_v55  ;;  %v575_v15 = vand.u32 3, %v2532_v59 }
 0x1a7   : > { %v1213_v40 = vor.u32 8388608, %v2538_v36  ;;  %vm1240_vm1 = vcmp.lt.s32.totalorder %v2558_v62, 4  ;;  %vm1237_vm2 = vcmp.lt.s32.totalorder %v2558_v62, 1  ;;  %vm1239_vm3 = vcmp.lt.s32.totalorder %v2558_v62, 3 }
 0x1a8   : > { %v562_v56 = vadd.f32 -0.4999988, %v561_v27  ;;  %v569_v44 = vadd.f32 -0.16666654, %v568_v39  ;;  %v994_v5 = vadd.s32 536870912, %v993_v4  ;;  %v1245_v59 = vsel %vm1237_vm2, %v2584_v23, %v2586_v11 }
 0x1a9   : > { %v1246_v51 = vsel %vm1240_vm1, %v1233_v58, 920167782  ;;  %v1249_v55 = vsel %vm1237_vm2, %v2586_v11, %v2588_v45  ;;  %v1250_v38 = vsel %vm1240_vm1, %v1236_v60, 1326507024  ;;  %vm1238_vm4 = vcmp.lt.s32.totalorder %v2558_v62, 2 }
 0x1aa   : > { %v563_v3 = vmul.f32 %v562_v56, %v558_v41  ;;  %v570_v7 = vmul.f32 %v569_v44, %v558_v41  ;;  %v2596_v13 = vshrl.u32 %v994_v5, 30  ;;  %v1247_v17 = vsel %vm1239_vm3, %v2588_v45, %v1246_v51 }
 0x1ab   : > { %v1251_v10 = vsel %vm1239_vm3, %v1233_v58, %v1250_v38  ;;  %v2616_v57 = vshll.u32 %v1213_v40, 8  ;;  %vm573_vm5 = vweird.f32 %v2226_v49  ;;  %vm576_vm6 = vcmp.lt.s32.totalorder %v575_v15, 2 }
 0x1ac   : > { %v564_v36 = vadd.f32 1.0, %v563_v3  ;;  %v571_v35 = vadd.f32 1.0, %v570_v7  ;;  %v996_v2 = vshll.u32 %v2596_v13, 30  ;;  %v1252_v22 = vsel %vm1238_vm4, %v1249_v55, %v1251_v10 }
 0x1ad   : > { %vm577_vm7 = vcmp.eq.s32.totalorder %v575_v15, 0  ;;  %v1248_v41 = vsel %vm1238_vm4, %v1245_v59, %v1247_v17  ;;  %vm580_vm8 = vcmp.eq.s32.totalorder %v575_v15, 2  ;;  %v1255_v29 = vshrl.u32 %v2616_v57, 16 }
 0x1ae   : > { %v572_v46 = vmul.f32 %v571_v35, %v556_v48  ;;  %v581_v18 = vxor.u32 2147483648, %v564_v36  ;;  %v997_v21 = vsub.s32 %v993_v4, %v996_v2  ;;  %v1256_v20 = vand.u32 65535, %v1252_v22 }
 0x1af   : > { %v1254_v47 = vand.u32 65535, %v2616_v57  ;;  %v1257_v9 = vshrl.u32 %v1252_v22, 16  ;;  %v1278_v24 = vand.u32 65535, %v1248_v41  ;;  %v1279_v14 = vshrl.u32 %v1248_v41, 16 }
 0x1b0   : > { %v578_v25 = vxor.u32 2147483648, %v572_v46  ;;  %vm998_vm10 = vcmp.lt.s32.totalorder %v997_v21, 0  ;;  %v999_v48 = vsub.s32 0, %v997_v21  ;;  %v582_v63 = vsel %vm580_vm8, %v581_v18, %v572_v46 }
 0x1b1   : > { %v1260_v34 = vmul.u32 %v1256_v20, %v1255_v29  ;;  %v1259_v37 = vmul.u32 %v1257_v9, %v1254_v47  ;;  %v1258_v16 = vmul.u32 %v1256_v20, %v1254_v47  ;;  %v1261_v31 = vmul.u32 %v1257_v9, %v1255_v29 }
 0x1b2   : > { %v579_v28 = vsel %vm577_vm7, %v564_v36, %v578_v25  ;;  %v1000_v61 = vsel %vm998_vm10, %v999_v48, %v997_v21  ;;  %v1281_v39 = vmul.u32 %v1279_v14, %v1254_v47  ;;  %v1282_v53 = vmul.u32 %v1278_v24, %v1255_v29 }
 0x1b3   : > { %v583_v1 = vsel %vm576_vm6, %v579_v28, %v582_v63  ;;  %v1001_v19 = vclz %v1000_v61  ;;  %v1262_v8 = vshll.u32 %v1259_v37, 16  ;;  %v1264_v33 = vshll.u32 %v1260_v34, 16 }
 0x1b4   : > { %v584_v26 = vsel %vm573_vm5, nan, %v583_v1  ;;  %v989_v58 = vadd.s32 %v2560_v32, %v2566_v42  ;;  %v1263_v4 = vshrl.u32 %v1259_v37, 16  ;;  %v1284_v60 = vshll.u32 %v1281_v39, 16 }
 0x1b5   : > { %1361 = vst [vmem:[%s2219_s28 + $0x8] sm:$0xff] %v584_v26  ;;  %v1486_v54 = vadd.s32 4294967294, %v1001_v19  ;;  %vm1266_vm9 = vc.u32 %v1258_v16, %v1262_v8  ;;  %v1268_v27 = vadd.s32 %v1262_v8, %v1258_v16  ;;  %v1280_v3 = vmul.u32 %v1278_v24, %v1254_v47 }
 0x1b6   : > { %v1267_v56 = vsel %vm1266_vm9, 1, %v1760_v12  ;;  %v1283_v59 = vmul.u32 %v1279_v14, %v1255_v29  ;;  %v1286_v55 = vshll.u32 %v1282_v53, 16  ;;  %v1242_v42 = vsel %vm1240_vm1, %v2588_v45, 2102212464 }
 0x1b7   : > { %vm1487_vm13 = vcmp.lt.s32.totalorder %v1486_v54, 0  ;;  %v1269_v44 = vadd.s32 %v1267_v56, %v1261_v31  ;;  %vm1270_vm11 = vc.u32 %v1268_v27, %v1264_v33  ;;  %vm1288_vm12 = vc.u32 %v1280_v3, %v1284_v60 }
 0x1b8   : > { %v1004_v49 = vsel %vm1487_vm13, 0, %v1486_v54  ;;  %v1271_v40 = vsel %vm1270_vm11, 1, %v1760_v12  ;;  %v1290_v32 = vadd.s32 %v1284_v60, %v1280_v3  ;;  %v1289_v38 = vsel %vm1288_vm12, 1, %v1760_v12 }
 0x1b9   : > { %v1005_v15 = vsub.s32 32, %v1004_v49  ;;  %v1009_v5 = vsub.s32 4294967266, %v1004_v49  ;;  %v1006_v7 = vshll.u32 %v997_v21, %v1004_v49  ;;  %v1273_v51 = vadd.s32 %v1271_v40, %v1269_v44 }
 0x1ba   : > { %v1291_v46 = vadd.s32 %v1289_v38, %v1283_v59  ;;  %vm1292_vm14 = vc.u32 %v1290_v32, %v1286_v55  ;;  %v1221_v18 = vshrl.u32 %v1754_v52, %v2553_v43  ;;  %v1265_v22 = vshrl.u32 %v1260_v34, 16 }
 0x1bb   : > { %v1007_v36 = vshrl.u32 %v989_v58, %v1005_v15  ;;  %v1010_v35 = vadd.s32 127, %v1009_v5  ;;  %v1274_v17 = vadd.s32 %v1273_v51, %v1263_v4  ;;  %v1293_v21 = vsel %vm1292_vm14, 1, %v1760_v12 }
 0x1bc   : > { %v1285_v25 = vshrl.u32 %v1281_v39, 16  ;;  %v1295_v29 = vadd.s32 %v1293_v21, %v1291_v46  ;;  %v1241_v45 = vsel %vm1237_vm2, %v1221_v18, %v2584_v23  ;;  %v1243_v20 = vsel %vm1239_vm3, %v2586_v11, %v1242_v42 }
 0x1bd   : > { %v1008_v2 = vor.u32 %v1007_v36, %v1006_v7  ;;  %v1011_v10 = vshll.u32 %v1010_v35, 23  ;;  %v1275_v48 = vadd.s32 %v1274_v17, %v1265_v22  ;;  %v1287_v28 = vshrl.u32 %v1282_v53, 16 }
 0x1be   : > { %v1296_v63 = vadd.s32 %v1295_v29, %v1285_v25  ;;  %v1294_v52 = vadd.s32 %v1290_v32, %v1286_v55  ;;  %v1244_v12 = vsel %vm1238_vm4, %v1241_v45, %v1243_v20  ;;  %vm897_vm15 = vcmp.lt.s32.totalorder %v2420_v30, 0 }
 0x1bf   : > { %v1012_v41 = vor.u32 4788187, %v1011_v10  ;;  %v1015_v9 = vcvt.s32.f32 %v1008_v2  ;;  %v1298_v23 = vmul.u32 %v2616_v57, %v1244_v12  ;;  %vm2652_vm1 = vcmp.le.f32.partialorder %v895_v6, 0.7853982 }
 0x1c0   : > { %v1297_v34 = vadd.s32 %v1296_v63, %v1287_v28  ;;  %vm1300_vm0 = vc.u32 %v1275_v48, %v1294_v52  ;;  %v1019_v37 = vsub.s32 4, %v2596_v13  ;;  %v1299_v32 = vadd.s32 %v1294_v52, %v1275_v48 }
 0x1c1   : > { %v1013_v47 = vand.u32 2147483647, %v1012_v41  ;;  %vm1038_vm7 = vweird.f32 %v2420_v30  ;;  %vm1207_vm8 = vcmp.lt.s32.totalorder %v2422_v50, 0  ;;  %vm1206_vm10 = vcmp.le.f32.partialorder %v1205_v0, 0.7853982 }
 0x1c2   : > { %v1301_v1 = vadd.s32 1, %v1297_v34  ;;  %v1020_v8 = vsel %vm897_vm15, %v1019_v37, %v2596_v13  ;;  %vm1348_vm12 = vweird.f32 %v2422_v50 }
 0x1c3   : > { %v1016_v43 = vmul.f32 %v1015_v9, %v1013_v47  ;;  %v1022_v27 = vsel %vm2652_vm1, 0, %v1020_v8 }
 0x1c4   : > { %v1302_v14 = vsel %vm1300_vm0, %v1301_v1, %v1297_v34  ;;  %v1039_v44 = vadd.s32 3, %v1022_v27 }
 0x1c5   : > { %v1017_v24 = vxor.u32 2147483648, %v1016_v43  ;;  %v1303_v26 = vadd.s32 %v1302_v14, %v1298_v23 }
 0x1c6   : > { %v1040_v7 = vand.u32 3, %v1039_v44 }
 0x1c7   : > { %v1018_v61 = vsel %vm897_vm15, %v1017_v24, %v1016_v43  ;;  %v1304_v16 = vadd.s32 536870912, %v1303_v26 }
 0x1c8   : > { %v1021_v62 = vsel %vm2652_vm1, %v2420_v30, %v1018_v61  ;;  %vm1041_vm3 = vcmp.lt.s32.totalorder %v1040_v7, 2  ;;  %vm1042_vm5 = vcmp.eq.s32.totalorder %v1040_v7, 0  ;;  %vm1045_vm6 = vcmp.eq.s32.totalorder %v1040_v7, 2 }
 0x1c9   : > { %v1023_v19 = vmul.f32 %v1021_v62, %v1021_v62  ;;  %v1305_v31 = vshrl.u32 %v1304_v16, 30 }
 0x1cb   : > { %v1024_v57 = vmul.f32 -0.001358992, %v1023_v19  ;;  %v1031_v54 = vmul.f32 -0.00019511016, %v1023_v19  ;;  %v1306_v39 = vshll.u32 %v1305_v31, 30  ;;  %v1329_v28 = vsub.s32 4, %v1305_v31 }
 0x1cd   : > { %v1025_v6 = vadd.f32 0.041655596, %v1024_v57  ;;  %v1032_v33 = vadd.f32 0.008332121, %v1031_v54  ;;  %v1307_v4 = vsub.s32 %v1303_v26, %v1306_v39  ;;  %v1330_v34 = vsel %vm1207_vm8, %v1329_v28, %v1305_v31 }
 0x1ce   : > { %v1332_v23 = vsel %vm1206_vm10, 0, %v1330_v34 }
 0x1cf   : > { %v1026_v53 = vmul.f32 %v1025_v6, %v1023_v19  ;;  %v1033_v58 = vmul.f32 %v1032_v33, %v1023_v19  ;;  %vm1308_vm2 = vcmp.lt.s32.totalorder %v1307_v4, 0  ;;  %v1309_v60 = vsub.s32 0, %v1307_v4 }
 0x1d1   : > { %v1027_v56 = vadd.f32 -0.4999988, %v1026_v53  ;;  %v1034_v49 = vadd.f32 -0.16666654, %v1033_v58  ;;  %v1310_v13 = vsel %vm1308_vm2, %v1309_v60, %v1307_v4 }
 0x1d2   : > { %v1311_v51 = vclz %v1310_v13 }
 0x1d3   : > { %v1028_v15 = vmul.f32 %v1027_v56, %v1023_v19  ;;  %v1035_v5 = vmul.f32 %v1034_v49, %v1023_v19 }
 0x1d4   : > { %v1492_v36 = vadd.s32 4294967294, %v1311_v51 }
 0x1d5   : > { %v1029_v40 = vadd.f32 1.0, %v1028_v15  ;;  %v1036_v3 = vadd.f32 1.0, %v1035_v5 }
 0x1d6   : > { %vm1493_vm4 = vcmp.lt.s32.totalorder %v1492_v36, 0 }
 0x1d7   : > { %v1037_v59 = vmul.f32 %v1036_v3, %v1021_v62  ;;  %v1046_v55 = vxor.u32 2147483648, %v1029_v40  ;;  %v1314_v42 = vsel %vm1493_vm4, 0, %v1492_v36  ;;  %v1349_v62 = vadd.s32 3, %v1332_v23 }
 0x1d8   : > { %v1315_v2 = vsub.s32 32, %v1314_v42  ;;  %v1319_v10 = vsub.s32 4294967266, %v1314_v42  ;;  %v1316_v22 = vshll.u32 %v1307_v4, %v1314_v42 }
 0x1d9   : > { %v1043_v35 = vxor.u32 2147483648, %v1037_v59  ;;  %v1047_v38 = vsel %vm1045_vm6, %v1046_v55, %v1037_v59  ;;  %v1350_v8 = vand.u32 3, %v1349_v62 }
 0x1da   : > { %v1317_v21 = vshrl.u32 %v1299_v32, %v1315_v2  ;;  %v1320_v41 = vadd.s32 127, %v1319_v10 }
 0x1db   : > { %v1044_v17 = vsel %vm1042_vm5, %v1029_v40, %v1043_v35  ;;  %vm1352_vm9 = vcmp.eq.s32.totalorder %v1350_v8, 0  ;;  %vm1355_vm13 = vcmp.eq.s32.totalorder %v1350_v8, 2  ;;  %vm1351_vm11 = vcmp.lt.s32.totalorder %v1350_v8, 2 }
 0x1dc   : > { %v1048_v46 = vsel %vm1041_vm3, %v1044_v17, %v1047_v38  ;;  %v1318_v25 = vor.u32 %v1317_v21, %v1316_v22  ;;  %v1321_v29 = vshll.u32 %v1320_v41, 23 }
 0x1dd   : > { %v1049_v18 = vsel %vm1038_vm7, nan, %v1048_v46 }
 0x1de   : > { %1364 = vst [vmem:[%s2219_s28 + $0x20] sm:$0xff] %v1049_v18  ;;  %v1322_v45 = vor.u32 4788187, %v1321_v29  ;;  %v1325_v47 = vcvt.s32.f32 %v1318_v25 }
 0x1e0   : > { %v1323_v20 = vand.u32 2147483647, %v1322_v45 }
 0x1e2   : > { %v1326_v9 = vmul.f32 %v1325_v47, %v1323_v20 }
 0x1e4   : > { %v1327_v48 = vxor.u32 2147483648, %v1326_v9 }
 0x1e6   : > { %v1328_v30 = vsel %vm1207_vm8, %v1327_v48, %v1326_v9 }
 0x1e7   : > { %v1331_v63 = vsel %vm1206_vm10, %v2422_v50, %v1328_v30 }
 0x1e8   : > { %v1333_v52 = vmul.f32 %v1331_v63, %v1331_v63 }
 0x1ea   : > { %v1334_v43 = vmul.f32 -0.001358992, %v1333_v52  ;;  %v1341_v12 = vmul.f32 -0.00019511016, %v1333_v52 }
 0x1ec   : > { %v1335_v24 = vadd.f32 0.041655596, %v1334_v43  ;;  %v1342_v1 = vadd.f32 0.008332121, %v1341_v12 }
 0x1ee   : > { %v1336_v11 = vmul.f32 %v1335_v24, %v1333_v52  ;;  %v1343_v61 = vmul.f32 %v1342_v1, %v1333_v52 }
 0x1f0   : > { %v1337_v37 = vadd.f32 -0.4999988, %v1336_v11  ;;  %v1344_v14 = vadd.f32 -0.16666654, %v1343_v61 }
 0x1f2   : > { %v1338_v0 = vmul.f32 %v1337_v37, %v1333_v52  ;;  %v1345_v26 = vmul.f32 %v1344_v14, %v1333_v52 }
 0x1f4   : > { %v1339_v19 = vadd.f32 1.0, %v1338_v0  ;;  %v1346_v16 = vadd.f32 1.0, %v1345_v26 }
 0x1f6   : > { %v1347_v57 = vmul.f32 %v1346_v16, %v1331_v63  ;;  %v1356_v54 = vxor.u32 2147483648, %v1339_v19 }
 0x1f8   : > { %v1353_v31 = vxor.u32 2147483648, %v1347_v57  ;;  %v1357_v33 = vsel %vm1355_vm13, %v1356_v54, %v1347_v57 }
 0x1fa   : > { %v1354_v6 = vsel %vm1352_vm9, %v1339_v19, %v1353_v31 }
 0x1fb   : > { %v1358_v27 = vsel %vm1351_vm11, %v1354_v6, %v1357_v33 }
 0x1fc   : > { %v1359_v39 = vsel %vm1348_vm12, nan, %v1358_v27 }
 0x1fd   : > { %1366 = vst [vmem:[%s2219_s28 + $0x30] sm:$0xff] %v1359_v39 }
 0x1fe   : > { %1706 = shalt.err (!%p1703_p10)
}
 0x1ff   : > { %s1761_s8 = smov 128   ;;  %s1762_s23 = smov 8  }
 0x200   : > { %1555 = dma.vmem_to_hbm [thread:$0]  (%p1853_p7), %s1381_s30, 896, %s1383_s7, %s1368_s16, %s1761_s8, %s1761_s8, %s1762_s23  }
 0x201 PF: > { %s1397_s28 = sand.u32 1, %s1737_s12   ;;  %p2726_p12 = scmp.ge.s32.totalorder %s1749_s15, 2 }
 0x202   : > { %s1398_s17 = scalar_lea.sflag [#allocation4], %s1397_s28 }
 0x203   : > { %p1566_p13 = pnand %p2726_p12, %p1818_p6 }
 0x205   : > { %p1567_p0 = pneg %p1566_p13 }
 0x207   : > { %1732 = dma.done.wait (%p1567_p0), %s1398_s17, 896  }
 0x208   : > { %1734 = vsyncadd (%p1567_p0), %s1398_s17, 4294966400  ;;  %p17_p3 = scmp.ge.s32.totalorder %s1836_s26, 4   ;;  %s2727_s12 = smov %s1741_s13 }
 0x209   : > { %s2728_s13 = smov %s1745_s14  ;;  %s2729_s14 = smov %s1849_s4 }
 0x20a   : > { %s2730_s15 = smov %s1836_s26  ;;  %19 = sbr.rel (!%p17_p3) target bundleno = 6 (0x6), region = 81 }
 0x20f   :  { %1404 = vsyncpa [#allocation3], 1 }
 0x210   :  { %1406 = vsyncpa [#allocation3 + $0x1], 1 }
 0x211   :  { %1407 = vsyncpa [#allocation6], 1 }
 0x212   :  { %1408 = vsyncpa [#allocation4], 1 }
 0x213   :  { %1410 = vsyncpa [#allocation4 + $0x1], 1 }

</bundles_post_ra>
